<compile_context>
chip_gen: v6e
topology: v6e:2x2x1
jax: 0.10.0
libtpu: 0.0.40
codegen_flags: <defaults>
</compile_context>

<pallas_src>
import functools

import jax
import jax.numpy as jnp
from jax.experimental import pallas as pl
from jax.experimental.pallas import tpu as pltpu


_LN_EPS = 1e-6  # Block uses norm_layer(embed_dim, eps=1e-06)

_SEQ_TILES = (1024, 768, 512, 384, 256, 128, 64, 32, 16, 8)
_HID_TILES = (4096, 2048, 1024, 512, 256, 128)


def _layernorm(x, gamma, beta, eps=_LN_EPS):
    mu = jnp.mean(x, axis=-1, keepdims=True)
    var = jnp.mean((x - mu) ** 2, axis=-1, keepdims=True)
    return (x - mu) * jax.lax.rsqrt(var + eps) * gamma + beta


# --------------------- Kernel A: LayerNorm1 + QKV projection ---------------------

def qkv_kernel(x_ref, g_ref, b_ref,
               wq_ref, bq_ref, wk_ref, bk_ref, wv_ref, bv_ref,
               q_ref, k_ref, v_ref,
               *, num_heads, head_dim):
    x = x_ref[0]                                            # (TS, D) f32
    ts = x.shape[0]
    scale = head_dim ** (-0.5)

    xn = _layernorm(x, g_ref[...], b_ref[...])
    xn_b = xn.astype(jnp.bfloat16)

    # Fold 1/sqrt(hd) into q here (H*TS*hd mults once) instead of scaling the
    # (H, TQ, TK) score tensor every K step in the attention kernel.
    q = (jnp.dot(xn_b, wq_ref[...], preferred_element_type=jnp.float32)
         + bq_ref[...]) * scale
    k = jnp.dot(xn_b, wk_ref[...], preferred_element_type=jnp.float32) + bk_ref[...]
    v = jnp.dot(xn_b, wv_ref[...], preferred_element_type=jnp.float32) + bv_ref[...]

    # (TS, D) -> (H, TS, hd): relayout once here so the attention K loop is
    # pure MXU work (no per-step reshape/transpose/concat).
    def to_heads(t):
        return t.reshape(ts, num_heads, head_dim).transpose(1, 0, 2)

    q_ref[0] = to_heads(q).astype(q_ref.dtype)
    k_ref[0] = to_heads(k).astype(k_ref.dtype)
    v_ref[0] = to_heads(v).astype(v_ref.dtype)


# ------------- Kernel B: flash attention + output proj + residual 1 -------------

def attn_kernel(x_ref, q_ref, k_ref, v_ref, wproj_ref, bproj_ref, o_ref,
                m_sc, l_sc, acc_sc,
                *, num_heads, head_dim):
    ki = pl.program_id(2)

    @pl.when(ki == 0)
    def _init():
        m_sc[...] = jnp.full(m_sc.shape, -jnp.inf, jnp.float32)
        l_sc[...] = jnp.zeros(l_sc.shape, jnp.float32)
        acc_sc[...] = jnp.zeros(acc_sc.shape, jnp.float32)

    q = q_ref[0]                                            # (H, TQ, hd) bf16, pre-scaled
    k = k_ref[0]                                            # (H, TK, hd) bf16
    v = v_ref[0]                                            # (H, TK, hd) bf16

    s = jnp.einsum("hqd,hkd->hqk", q, k,
                   preferred_element_type=jnp.float32)      # (H, TQ, TK) f32

    m_prev = m_sc[...]                                      # (H, TQ, 1)
    m_new = jnp.maximum(m_prev, s.max(axis=-1, keepdims=True))
    alpha = jnp.exp(m_prev - m_new)
    p = jnp.exp(s - m_new)                                  # (H, TQ, TK) f32
    l_sc[...] = alpha * l_sc[...] + p.sum(axis=-1, keepdims=True)
    acc_sc[...] = alpha * acc_sc[...] + jnp.einsum(
        "hqk,hkd->hqd", p.astype(jnp.bfloat16), v,
        preferred_element_type=jnp.float32)                 # (H, TQ, hd)
    m_sc[...] = m_new

    @pl.when(ki == pl.num_programs(2) - 1)
    def _finalize():
        inv_l = pl.reciprocal(l_sc[...], approx=True)       # EUP divide
        o = acc_sc[...] * inv_l                             # (H, TQ, hd) f32
        # TODO(synk): for hd < 128 this is a cross-lane relayout; the reshaped-
        # weight einsum alternative needs multi-contraction dot_general support
        # in Mosaic, so the transpose is kept (cheap once per q-tile).
        attn = o.transpose(1, 0, 2).reshape(-1, num_heads * head_dim)  # (TQ, D)
        proj = jnp.dot(attn.astype(jnp.bfloat16), wproj_ref[...],
                       preferred_element_type=jnp.float32) + bproj_ref[...]
        o_ref[0] = (x_ref[0] + proj).astype(o_ref.dtype)    # residual 1


# ------------- Kernel C: LayerNorm2 + MLP (hidden-chunked) + residual 2 -------------

def mlp_kernel(x1_ref, g_ref, b_ref, w1_ref, b1_ref, w2_ref, b2_ref, o_ref,
               xn2_sc, acc_sc):
    hi = pl.program_id(2)

    @pl.when(hi == 0)
    def _init():
        xn2 = _layernorm(x1_ref[0], g_ref[...], b_ref[...])
        xn2_sc[...] = xn2.astype(xn2_sc.dtype)              # cache LN2(x1) in bf16
        acc_sc[...] = jnp.zeros(acc_sc.shape, jnp.float32)

    # One TH-wide hidden chunk per grid step: bounds the live (TM, TH) activation
    # and lets BlockSpec pipeline the w1/w2 chunks (no full (TM, hidden) f32 buffer).
    h = jnp.dot(xn2_sc[...], w1_ref[...],
                preferred_element_type=jnp.float32) + b1_ref[...]
    h = jax.nn.gelu(h, approximate=False)                   # exact GELU (nn.GELU)
    acc_sc[...] += jnp.dot(h.astype(jnp.bfloat16), w2_ref[...],
                           preferred_element_type=jnp.float32)

    @pl.when(hi == pl.num_programs(2) - 1)
    def _finalize():
        o_ref[0] = (x1_ref[0] + acc_sc[...] + b2_ref[...]).astype(o_ref.dtype)


# --------------------------- VMEM budgeting / tile picking ---------------------------

def _vmem_capacity():
    try:
        cap = int(getattr(pltpu.get_tpu_info(), "vmem_capacity_bytes", 0))
        if cap > 0:
            return cap
    except Exception:
        pass
    return 64 << 20  # v7x per-TensorCore VMEM (smallest current generation)


def _candidates(n, prefer):
    c = [t for t in prefer if t <= n and n % t == 0]
    return c if c else [n]


def _qkv_vmem_bytes(ts, D, H, hd, single_buffer):
    wbuf = 1 if single_buffer else 2
    b = 2 * ts * D * 4                                   # x tile (f32), double-buffered
    b += wbuf * (3 * D * D * 2 + 3 * D * 4 + 2 * D * 4)  # wq/wk/wv bf16 + biases + LN1
    b += 3 * 2 * H * ts * hd * 2                         # q/k/v outputs (bf16)
    b += 4 * ts * D * 4                                  # xn / q / k / v f32 intermediates
    return b


def _attn_vmem_bytes(tq, tk, D, H, hd, single_buffer):
    wbuf = 1 if single_buffer else 2
    b = 2 * tq * D * 4                                   # x row tile (f32)
    b += 2 * H * tq * hd * 2                             # q (bf16)
    b += 2 * 2 * H * tk * hd * 2                         # k + v (bf16)
    b += wbuf * (D * D * 2 + D * 4)                      # wproj (bf16) + bproj
    b += 2 * tq * D * 4                                  # output tile
    b += (2 * H * tq + H * tq * hd) * 4                  # m / l / acc scratch
    b += 2 * H * tq * tk * 4                             # s and p score tensors (f32)
    b += 2 * tq * D * 4                                  # finalize intermediates
    return b


def _mlp_vmem_bytes(tm, th, D, hidden, single_buffer):
    wbuf = 1 if single_buffer else 2
    b = 2 * tm * D * 4                                   # x1 tile
    b += 2 * (D * th * 2 + th * D * 2 + th * 4)          # w1/w2/b1 chunks (double-buffered)
    b += wbuf * (2 * D * 4 + D * 4)                      # LN2 params + b2
    b += 2 * tm * D * 4                                  # output tile
    b += tm * D * 2 + tm * D * 4                         # xn2 bf16 + acc f32 scratch
    b += 2 * tm * th * 4                                 # h intermediate
    return b


def _pick_row_tile(n, bytes_fn, budget):
    cands = _candidates(n, _SEQ_TILES)
    for t in cands:
        if bytes_fn(t) <= budget:
            return t
    return cands[-1]


def _pick_attn_tiles(S, bytes_fn, budget):
    cands = _candidates(S, _SEQ_TILES)
    # Keep TQ as large as possible (K/V HBM re-reads scale with S/TQ); shrink TK
    # first (TK only affects the (H, TQ, TK) score footprint / per-step DMA).
    for tq in cands:
        for tk in cands:
            if bytes_fn(tq, tk) <= budget:
                return tq, tk
    return cands[-1], cands[-1]


def _pick_mlp_tiles(S, hidden, bytes_fn, budget):
    row_c = _candidates(S, _SEQ_TILES)
    hid_c = _candidates(hidden, _HID_TILES)
    for tm in row_c:
        for th in hid_c:
            if bytes_fn(tm, th) <= budget:
                return tm, th
    return row_c[-1], hid_c[-1]


def _compiler_params(semantics, est_bytes, cap):
    limit = max(est_bytes + (8 << 20), 32 << 20)
    limit = int(min(limit, cap - (2 << 20), 128 << 20))
    return pltpu.CompilerParams(dimension_semantics=semantics,
                                vmem_limit_bytes=limit)


# --------------------------------- wrapper ---------------------------------

def _forward(x, params, num_heads, single_buffer_weights):
    B, S, D = x.shape
    H = num_heads
    hd = D // H
    hidden = params["w1"].shape[1]
    bf16 = jnp.bfloat16

    cap = _vmem_capacity()
    budget = int((cap - (6 << 20)) * 0.8)   # tile-selection budget with headroom

    def const_spec(a):
        nd = a.ndim
        if single_buffer_weights:
            # Constant index map -> never re-fetched; single-buffer to halve
            # its resident VMEM footprint.
            return pl.BlockSpec(a.shape, lambda *_, _nd=nd: (0,) * _nd,
                                pipeline_mode=pl.Buffered(1))
        return pl.BlockSpec(a.shape, lambda *_, _nd=nd: (0,) * _nd)

    # Split the fused QKV weight at the wrapper level (XLA slices, outside the
    # kernels) so the kernels never do lane-crossing column slices.
    wqkv, bqkv = params["wqkv"], params["bqkv"]
    wq = wqkv[:, 0:D].astype(bf16)
    wk = wqkv[:, D:2 * D].astype(bf16)
    wv = wqkv[:, 2 * D:3 * D].astype(bf16)
    bq = bqkv[:, 0:D]
    bk = bqkv[:, D:2 * D]
    bv = bqkv[:, 2 * D:3 * D]

    # ----- Kernel A: LN1 + QKV projection (head-major bf16 outputs) -----
    TS = _pick_row_tile(
        S, lambda t: _qkv_vmem_bytes(t, D, H, hd, single_buffer_weights), budget)
    a_params = [params["ln1_g"], params["ln1_b"], wq, bq, wk, bk, wv, bv]
    kernel_a = functools.partial(qkv_kernel, num_heads=H, head_dim=hd)
    est_a = _qkv_vmem_bytes(TS, D, H, hd, single_buffer_weights)

    q_all, k_all, v_all = pl.pallas_call(
        kernel_a,
        out_shape=tuple(jax.ShapeDtypeStruct((B, H, S, hd), bf16) for _ in range(3)),
        grid_spec=pltpu.PrefetchScalarGridSpec(
            num_scalar_prefetch=0,
            grid=(B, S // TS),
            in_specs=[pl.BlockSpec((1, TS, D), lambda b, si: (b, si, 0))]
                     + [const_spec(p) for p in a_params],
            out_specs=[pl.BlockSpec((1, H, TS, hd), lambda b, si: (b, 0, si, 0))] * 3,
        ),
        compiler_params=_compiler_params(("parallel", "parallel"), est_a, cap),
    )(x, *a_params)

    # ----- Kernel B: flash attention + output projection + residual 1 -----
    TQ, TK = _pick_attn_tiles(
        S, lambda tq, tk: _attn_vmem_bytes(tq, tk, D, H, hd, single_buffer_weights),
        budget)
    wproj = params["wproj"].astype(bf16)
    b_params = [wproj, params["bproj"]]
    kernel_b = functools.partial(attn_kernel, num_heads=H, head_dim=hd)
    est_b = _attn_vmem_bytes(TQ, TK, D, H, hd, single_buffer_weights)

    x1 = pl.pallas_call(
        kernel_b,
        out_shape=jax.ShapeDtypeStruct((B, S, D), x.dtype),
        grid_spec=pltpu.PrefetchScalarGridSpec(
            num_scalar_prefetch=0,
            grid=(B, S // TQ, S // TK),
            in_specs=[pl.BlockSpec((1, TQ, D), lambda b, qi, ki: (b, qi, 0)),
                      pl.BlockSpec((1, H, TQ, hd), lambda b, qi, ki: (b, 0, qi, 0)),
                      pl.BlockSpec((1, H, TK, hd), lambda b, qi, ki: (b, 0, ki, 0)),
                      pl.BlockSpec((1, H, TK, hd), lambda b, qi, ki: (b, 0, ki, 0))]
                     + [const_spec(p) for p in b_params],
            out_specs=pl.BlockSpec((1, TQ, D), lambda b, qi, ki: (b, qi, 0)),
            scratch_shapes=[
                pltpu.VMEM((H, TQ, 1), jnp.float32),           # running max
                pltpu.VMEM((H, TQ, 1), jnp.float32),           # running sum
                pltpu.VMEM((H, TQ, hd), jnp.float32),          # accumulator
            ]),
        compiler_params=_compiler_params(
            ("parallel", "parallel", "arbitrary"), est_b, cap),
    )(x, q_all, k_all, v_all, *b_params)

    # ----- Kernel C: LN2 + MLP (hidden-chunked) + residual 2 -----
    TM, TH = _pick_mlp_tiles(
        S, hidden,
        lambda tm, th: _mlp_vmem_bytes(tm, th, D, hidden, single_buffer_weights),
        budget)
    w1 = params["w1"].astype(bf16)
    w2 = params["w2"].astype(bf16)
    est_c = _mlp_vmem_bytes(TM, TH, D, hidden, single_buffer_weights)

    out = pl.pallas_call(
        mlp_kernel,
        out_shape=jax.ShapeDtypeStruct((B, S, D), x.dtype),
        grid_spec=pltpu.PrefetchScalarGridSpec(
            num_scalar_prefetch=0,
            grid=(B, S // TM, hidden // TH),
            in_specs=[pl.BlockSpec((1, TM, D), lambda b, si, hi: (b, si, 0)),
                      const_spec(params["ln2_g"]),
                      const_spec(params["ln2_b"]),
                      pl.BlockSpec((D, TH), lambda b, si, hi: (0, hi)),
                      pl.BlockSpec((1, TH), lambda b, si, hi: (0, hi)),
                      pl.BlockSpec((TH, D), lambda b, si, hi: (hi, 0)),
                      const_spec(params["b2"])],
            out_specs=pl.BlockSpec((1, TM, D), lambda b, si, hi: (b, si, 0)),
            scratch_shapes=[
                pltpu.VMEM((TM, D), bf16),                     # cached LN2(x1)
                pltpu.VMEM((TM, D), jnp.float32),              # MLP accumulator
            ]),
        compiler_params=_compiler_params(
            ("parallel", "parallel", "arbitrary"), est_c, cap),
    )(x1, params["ln2_g"], params["ln2_b"], w1, params["b1"], w2, params["b2"])
    return out


def block_forward(x, params, num_heads):
    try:
        return _forward(x, params, num_heads, single_buffer_weights=True)
    except Exception:
        # TODO(synk): pl.Buffered(1) (single-buffered constant operands) not
        # accepted by this JAX build — fall back to default double buffering.
        return _forward(x, params, num_heads, single_buffer_weights=False)


# ----------------------------- params / reference -----------------------------

def init_params(key, embed_dim, num_heads, mlp_ratio):
    hidden = int(embed_dim * mlp_ratio)
    ks = jax.random.split(key, 8)
    s = 0.02
    # Linear weights stored as (in, out) so x @ W + b == PyTorch's x @ W.T + b.
    return {
        "ln1_g": jnp.ones((1, embed_dim), jnp.float32),
        "ln1_b": jnp.zeros((1, embed_dim), jnp.float32),
        "wqkv": s * jax.random.normal(ks[0], (embed_dim, 3 * embed_dim), jnp.float32),
        "bqkv": s * jax.random.normal(ks[1], (1, 3 * embed_dim), jnp.float32),
        "wproj": s * jax.random.normal(ks[2], (embed_dim, embed_dim), jnp.float32),
        "bproj": s * jax.random.normal(ks[3], (1, embed_dim), jnp.float32),
        "ln2_g": jnp.ones((1, embed_dim), jnp.float32),
        "ln2_b": jnp.zeros((1, embed_dim), jnp.float32),
        "w1": s * jax.random.normal(ks[4], (embed_dim, hidden), jnp.float32),
        "b1": s * jax.random.normal(ks[5], (1, hidden), jnp.float32),
        "w2": s * jax.random.normal(ks[6], (hidden, embed_dim), jnp.float32),
        "b2": s * jax.random.normal(ks[7], (1, embed_dim), jnp.float32),
    }


def block_reference(x, params, num_heads):
    """Pure-JAX f32 reference mirroring the PyTorch Block forward."""
    B, S, D = x.shape
    hd = D // num_heads
    scale = hd ** (-0.5)

    def ln(v, g, b):
        mu = jnp.mean(v, -1, keepdims=True)
        var = jnp.mean((v - mu) ** 2, -1, keepdims=True)
        return (v - mu) / jnp.sqrt(var + _LN_EPS) * g + b

    xn = ln(x, params["ln1_g"], params["ln1_b"])
    qkv = xn @ params["wqkv"] + params["bqkv"]
    q, k, v = jnp.split(qkv, 3, axis=-1)
    q = q.reshape(B, S, num_heads, hd).transpose(0, 2, 1, 3)
    k = k.reshape(B, S, num_heads, hd).transpose(0, 2, 1, 3)
    v = v.reshape(B, S, num_heads, hd).transpose(0, 2, 1, 3)
    attn = jnp.einsum("bhqd,bhkd->bhqk", q, k) * scale
    attn = jax.nn.softmax(attn, axis=-1)
    o = jnp.einsum("bhqk,bhkd->bhqd", attn, v)
    o = o.transpose(0, 2, 1, 3).reshape(B, S, D)
    o = o @ params["wproj"] + params["bproj"]
    x = x + o
    xn2 = ln(x, params["ln2_g"], params["ln2_b"])
    h = jax.nn.gelu(xn2 @ params["w1"] + params["b1"], approximate=False)
    h = h @ params["w2"] + params["b2"]
    return x + h


if __name__ == "__main__":
    B, S, D = 2, 8, 32
    num_heads, mlp_ratio = 4, 4

    key = jax.random.PRNGKey(0)
    kx, kp = jax.random.split(key)
    x = jax.random.normal(kx, (B, S, D), jnp.float32)
    params = init_params(kp, D, num_heads, mlp_ratio)

    out = block_forward(x, params, num_heads)
    out = jax.block_until_ready(out)

    ref = block_reference(x, params, num_heads)
    assert out.shape == (B, S, D)
    # bf16 MXU operands (f32 accumulate) + approx reciprocal -> loosened tolerance.
    assert jnp.allclose(out, ref, atol=2e-2, rtol=2e-2), (
        float(jnp.max(jnp.abs(out - ref))))

    print("KERNEL_OK")
</pallas_src>

<mosaic_0001>
module attributes {stable_mosaic.version = 11 : i64} {
  func.func @qkv_kernel(%arg0: i32, %arg1: i32, %arg2: memref<1x8x32xf32, #tpu.memory_space<vmem>>, %arg3: memref<1x32xf32, #tpu.memory_space<vmem>>, %arg4: memref<1x32xf32, #tpu.memory_space<vmem>>, %arg5: memref<32x32xbf16, #tpu.memory_space<vmem>>, %arg6: memref<1x32xf32, #tpu.memory_space<vmem>>, %arg7: memref<32x32xbf16, #tpu.memory_space<vmem>>, %arg8: memref<1x32xf32, #tpu.memory_space<vmem>>, %arg9: memref<32x32xbf16, #tpu.memory_space<vmem>>, %arg10: memref<1x32xf32, #tpu.memory_space<vmem>>, %arg11: memref<1x4x8x8xbf16, #tpu.memory_space<vmem>>, %arg12: memref<1x4x8x8xbf16, #tpu.memory_space<vmem>>, %arg13: memref<1x4x8x8xbf16, #tpu.memory_space<vmem>>) attributes {dimension_semantics = [#tpu.dimension_semantics<parallel>, #tpu.dimension_semantics<parallel>], iteration_bounds = array<i64: 2, 1>, scalar_prefetch = 0 : i64, scratch_operands = 0 : i64, tpu.core_type = #tpu.core_type<tc>, window_params = [{transform_indices = @transform_0, window_bounds = array<i64: 1, 8, 32>}, {pipeline_mode = #tpu.pipeline_mode<synchronous>, transform_indices = @transform_1, window_bounds = array<i64: 1, 32>}, {pipeline_mode = #tpu.pipeline_mode<synchronous>, transform_indices = @transform_2, window_bounds = array<i64: 1, 32>}, {pipeline_mode = #tpu.pipeline_mode<synchronous>, transform_indices = @transform_3, window_bounds = array<i64: 32, 32>}, {pipeline_mode = #tpu.pipeline_mode<synchronous>, transform_indices = @transform_4, window_bounds = array<i64: 1, 32>}, {pipeline_mode = #tpu.pipeline_mode<synchronous>, transform_indices = @transform_5, window_bounds = array<i64: 32, 32>}, {pipeline_mode = #tpu.pipeline_mode<synchronous>, transform_indices = @transform_6, window_bounds = array<i64: 1, 32>}, {pipeline_mode = #tpu.pipeline_mode<synchronous>, transform_indices = @transform_7, window_bounds = array<i64: 32, 32>}, {pipeline_mode = #tpu.pipeline_mode<synchronous>, transform_indices = @transform_8, window_bounds = array<i64: 1, 32>}, {transform_indices = @transform_9, window_bounds = array<i64: 1, 4, 8, 8>}, {transform_indices = @transform_10, window_bounds = array<i64: 1, 4, 8, 8>}, {transform_indices = @transform_11, window_bounds = array<i64: 1, 4, 8, 8>}]} {
    %c0 = arith.constant 0 : index
    %c0_0 = arith.constant 0 : index
    %c0_1 = arith.constant 0 : index
    %0 = vector.load %arg2[%c0, %c0_0, %c0_1] : memref<1x8x32xf32, #tpu.memory_space<vmem>>, vector<1x8x32xf32>
    %1 = vector.shape_cast %0 : vector<1x8x32xf32> to vector<8x32xf32>
    %c0_2 = arith.constant 0 : index
    %c0_3 = arith.constant 0 : index
    %2 = vector.load %arg3[%c0_2, %c0_3] : memref<1x32xf32, #tpu.memory_space<vmem>>, vector<1x32xf32>
    %c0_4 = arith.constant 0 : index
    %c0_5 = arith.constant 0 : index
    %3 = vector.load %arg4[%c0_4, %c0_5] : memref<1x32xf32, #tpu.memory_space<vmem>>, vector<1x32xf32>
    %cst = arith.constant dense<0.000000e+00> : vector<8xf32>
    %4 = vector.multi_reduction <add>, %1, %cst [1] : vector<8x32xf32> to vector<8xf32>
    %5 = vector.shape_cast %4 : vector<8xf32> to vector<8x1xf32>
    %cst_6 = arith.constant 3.200000e+01 : f32
    %6 = vector.broadcast %cst_6 : f32 to vector<8x1xf32>
    %7 = arith.divf %5, %6 : vector<8x1xf32>
    %8 = vector.broadcast %7 : vector<8x1xf32> to vector<8x32xf32>
    %9 = arith.subf %1, %8 : vector<8x32xf32>
    %10 = arith.mulf %9, %9 : vector<8x32xf32>
    %cst_7 = arith.constant dense<0.000000e+00> : vector<8xf32>
    %11 = vector.multi_reduction <add>, %10, %cst_7 [1] : vector<8x32xf32> to vector<8xf32>
    %12 = vector.shape_cast %11 : vector<8xf32> to vector<8x1xf32>
    %cst_8 = arith.constant 3.200000e+01 : f32
    %13 = vector.broadcast %cst_8 : f32 to vector<8x1xf32>
    %14 = arith.divf %12, %13 : vector<8x1xf32>
    %15 = vector.broadcast %7 : vector<8x1xf32> to vector<8x32xf32>
    %16 = arith.subf %1, %15 : vector<8x32xf32>
    %cst_9 = arith.constant 9.99999997E-7 : f32
    %17 = vector.broadcast %cst_9 : f32 to vector<8x1xf32>
    %18 = arith.addf %14, %17 : vector<8x1xf32>
    %19 = math.rsqrt %18 : vector<8x1xf32>
    %20 = vector.broadcast %19 : vector<8x1xf32> to vector<8x32xf32>
    %21 = arith.mulf %16, %20 : vector<8x32xf32>
    %22 = vector.broadcast %2 : vector<1x32xf32> to vector<8x32xf32>
    %23 = arith.mulf %21, %22 : vector<8x32xf32>
    %24 = vector.broadcast %3 : vector<1x32xf32> to vector<8x32xf32>
    %25 = arith.addf %23, %24 : vector<8x32xf32>
    %26 = arith.truncf %25 : vector<8x32xf32> to vector<8x32xbf16>
    %c0_10 = arith.constant 0 : index
    %c0_11 = arith.constant 0 : index
    %27 = vector.load %arg5[%c0_10, %c0_11] : memref<32x32xbf16, #tpu.memory_space<vmem>>, vector<32x32xbf16>
    %cst_12 = arith.constant dense<0.000000e+00> : vector<8x32xf32>
    %28 = tpu.matmul %26, %27, %cst_12 {dimension_numbers = #tpu.dot_dimension_numbers<[1], [0], [0], [1], [0, 0, 1, 1], [], []>} : vector<8x32xbf16>, vector<32x32xbf16>, vector<8x32xf32> -> vector<8x32xf32>
    %c0_13 = arith.constant 0 : index
    %c0_14 = arith.constant 0 : index
    %29 = vector.load %arg6[%c0_13, %c0_14] : memref<1x32xf32, #tpu.memory_space<vmem>>, vector<1x32xf32>
    %30 = vector.broadcast %29 : vector<1x32xf32> to vector<8x32xf32>
    %31 = arith.addf %28, %30 : vector<8x32xf32>
    %cst_15 = arith.constant 0.353553385 : f32
    %32 = vector.broadcast %cst_15 : f32 to vector<8x32xf32>
    %33 = arith.mulf %31, %32 : vector<8x32xf32>
    %c0_16 = arith.constant 0 : index
    %c0_17 = arith.constant 0 : index
    %34 = vector.load %arg7[%c0_16, %c0_17] : memref<32x32xbf16, #tpu.memory_space<vmem>>, vector<32x32xbf16>
    %cst_18 = arith.constant dense<0.000000e+00> : vector<8x32xf32>
    %35 = tpu.matmul %26, %34, %cst_18 {dimension_numbers = #tpu.dot_dimension_numbers<[1], [0], [0], [1], [0, 0, 1, 1], [], []>} : vector<8x32xbf16>, vector<32x32xbf16>, vector<8x32xf32> -> vector<8x32xf32>
    %c0_19 = arith.constant 0 : index
    %c0_20 = arith.constant 0 : index
    %36 = vector.load %arg8[%c0_19, %c0_20] : memref<1x32xf32, #tpu.memory_space<vmem>>, vector<1x32xf32>
    %37 = vector.broadcast %36 : vector<1x32xf32> to vector<8x32xf32>
    %38 = arith.addf %35, %37 : vector<8x32xf32>
    %c0_21 = arith.constant 0 : index
    %c0_22 = arith.constant 0 : index
    %39 = vector.load %arg9[%c0_21, %c0_22] : memref<32x32xbf16, #tpu.memory_space<vmem>>, vector<32x32xbf16>
    %cst_23 = arith.constant dense<0.000000e+00> : vector<8x32xf32>
    %40 = tpu.matmul %26, %39, %cst_23 {dimension_numbers = #tpu.dot_dimension_numbers<[1], [0], [0], [1], [0, 0, 1, 1], [], []>} : vector<8x32xbf16>, vector<32x32xbf16>, vector<8x32xf32> -> vector<8x32xf32>
    %c0_24 = arith.constant 0 : index
    %c0_25 = arith.constant 0 : index
    %41 = vector.load %arg10[%c0_24, %c0_25] : memref<1x32xf32, #tpu.memory_space<vmem>>, vector<1x32xf32>
    %42 = vector.broadcast %41 : vector<1x32xf32> to vector<8x32xf32>
    %43 = arith.addf %40, %42 : vector<8x32xf32>
    %44 = vector.shape_cast %33 : vector<8x32xf32> to vector<8x4x8xf32>
    %45 = tpu.transpose %44, [1, 0, 2] : vector<8x4x8xf32> -> vector<4x8x8xf32>
    %46 = arith.truncf %45 : vector<4x8x8xf32> to vector<4x8x8xbf16>
    %c0_26 = arith.constant 0 : index
    %c0_27 = arith.constant 0 : index
    %c0_28 = arith.constant 0 : index
    %c0_29 = arith.constant 0 : index
    %47 = vector.load %arg11[%c0_26, %c0_27, %c0_28, %c0_29] : memref<1x4x8x8xbf16, #tpu.memory_space<vmem>>, vector<1x4x8x8xbf16>
    %48 = vector.shape_cast %47 : vector<1x4x8x8xbf16> to vector<4x8x8xbf16>
    %49 = vector.shape_cast %46 : vector<4x8x8xbf16> to vector<1x4x8x8xbf16>
    tpu.vector_store %arg11[%c0_26, %c0_27, %c0_28, %c0_29], %49 {strides = array<i32>} : memref<1x4x8x8xbf16, #tpu.memory_space<vmem>>, vector<1x4x8x8xbf16>,
    %50 = vector.shape_cast %38 : vector<8x32xf32> to vector<8x4x8xf32>
    %51 = tpu.transpose %50, [1, 0, 2] : vector<8x4x8xf32> -> vector<4x8x8xf32>
    %52 = arith.truncf %51 : vector<4x8x8xf32> to vector<4x8x8xbf16>
    %c0_30 = arith.constant 0 : index
    %c0_31 = arith.constant 0 : index
    %c0_32 = arith.constant 0 : index
    %c0_33 = arith.constant 0 : index
    %53 = vector.load %arg12[%c0_30, %c0_31, %c0_32, %c0_33] : memref<1x4x8x8xbf16, #tpu.memory_space<vmem>>, vector<1x4x8x8xbf16>
    %54 = vector.shape_cast %53 : vector<1x4x8x8xbf16> to vector<4x8x8xbf16>
    %55 = vector.shape_cast %52 : vector<4x8x8xbf16> to vector<1x4x8x8xbf16>
    tpu.vector_store %arg12[%c0_30, %c0_31, %c0_32, %c0_33], %55 {strides = array<i32>} : memref<1x4x8x8xbf16, #tpu.memory_space<vmem>>, vector<1x4x8x8xbf16>,
    %56 = vector.shape_cast %43 : vector<8x32xf32> to vector<8x4x8xf32>
    %57 = tpu.transpose %56, [1, 0, 2] : vector<8x4x8xf32> -> vector<4x8x8xf32>
    %58 = arith.truncf %57 : vector<4x8x8xf32> to vector<4x8x8xbf16>
    %c0_34 = arith.constant 0 : index
    %c0_35 = arith.constant 0 : index
    %c0_36 = arith.constant 0 : index
    %c0_37 = arith.constant 0 : index
    %59 = vector.load %arg13[%c0_34, %c0_35, %c0_36, %c0_37] : memref<1x4x8x8xbf16, #tpu.memory_space<vmem>>, vector<1x4x8x8xbf16>
    %60 = vector.shape_cast %59 : vector<1x4x8x8xbf16> to vector<4x8x8xbf16>
    %61 = vector.shape_cast %58 : vector<4x8x8xbf16> to vector<1x4x8x8xbf16>
    tpu.vector_store %arg13[%c0_34, %c0_35, %c0_36, %c0_37], %61 {strides = array<i32>} : memref<1x4x8x8xbf16, #tpu.memory_space<vmem>>, vector<1x4x8x8xbf16>,
    return
  }
  func.func @transform_0(%arg0: i32, %arg1: i32) -> (i32, i32, i32) {
    %c0_i32 = arith.constant 0 : i32
    %c0_i32_0 = arith.constant 0 : i32
    return %arg0, %arg1, %c0_i32 : i32, i32, i32
  }
  func.func @transform_1(%arg0: i32, %arg1: i32) -> (i32, i32) {
    %c0_i32 = arith.constant 0 : i32
    %c0_i32_0 = arith.constant 0 : i32
    %c0_i32_1 = arith.constant 0 : i32
    return %c0_i32, %c0_i32_0 : i32, i32
  }
  func.func @transform_2(%arg0: i32, %arg1: i32) -> (i32, i32) {
    %c0_i32 = arith.constant 0 : i32
    %c0_i32_0 = arith.constant 0 : i32
    %c0_i32_1 = arith.constant 0 : i32
    return %c0_i32, %c0_i32_0 : i32, i32
  }
  func.func @transform_3(%arg0: i32, %arg1: i32) -> (i32, i32) {
    %c0_i32 = arith.constant 0 : i32
    %c0_i32_0 = arith.constant 0 : i32
    %c0_i32_1 = arith.constant 0 : i32
    return %c0_i32, %c0_i32_0 : i32, i32
  }
  func.func @transform_4(%arg0: i32, %arg1: i32) -> (i32, i32) {
    %c0_i32 = arith.constant 0 : i32
    %c0_i32_0 = arith.constant 0 : i32
    %c0_i32_1 = arith.constant 0 : i32
    return %c0_i32, %c0_i32_0 : i32, i32
  }
  func.func @transform_5(%arg0: i32, %arg1: i32) -> (i32, i32) {
    %c0_i32 = arith.constant 0 : i32
    %c0_i32_0 = arith.constant 0 : i32
    %c0_i32_1 = arith.constant 0 : i32
    return %c0_i32, %c0_i32_0 : i32, i32
  }
  func.func @transform_6(%arg0: i32, %arg1: i32) -> (i32, i32) {
    %c0_i32 = arith.constant 0 : i32
    %c0_i32_0 = arith.constant 0 : i32
    %c0_i32_1 = arith.constant 0 : i32
    return %c0_i32, %c0_i32_0 : i32, i32
  }
  func.func @transform_7(%arg0: i32, %arg1: i32) -> (i32, i32) {
    %c0_i32 = arith.constant 0 : i32
    %c0_i32_0 = arith.constant 0 : i32
    %c0_i32_1 = arith.constant 0 : i32
    return %c0_i32, %c0_i32_0 : i32, i32
  }
  func.func @transform_8(%arg0: i32, %arg1: i32) -> (i32, i32) {
    %c0_i32 = arith.constant 0 : i32
    %c0_i32_0 = arith.constant 0 : i32
    %c0_i32_1 = arith.constant 0 : i32
    return %c0_i32, %c0_i32_0 : i32, i32
  }
  func.func @transform_9(%arg0: i32, %arg1: i32) -> (i32, i32, i32, i32) {
    %c0_i32 = arith.constant 0 : i32
    %c0_i32_0 = arith.constant 0 : i32
    %c0_i32_1 = arith.constant 0 : i32
    return %arg0, %c0_i32, %arg1, %c0_i32_0 : i32, i32, i32, i32
  }
  func.func @transform_10(%arg0: i32, %arg1: i32) -> (i32, i32, i32, i32) {
    %c0_i32 = arith.constant 0 : i32
    %c0_i32_0 = arith.constant 0 : i32
    %c0_i32_1 = arith.constant 0 : i32
    return %arg0, %c0_i32, %arg1, %c0_i32_0 : i32, i32, i32, i32
  }
  func.func @transform_11(%arg0: i32, %arg1: i32) -> (i32, i32, i32, i32) {
    %c0_i32 = arith.constant 0 : i32
    %c0_i32_0 = arith.constant 0 : i32
    %c0_i32_1 = arith.constant 0 : i32
    return %arg0, %c0_i32, %arg1, %c0_i32_0 : i32, i32, i32, i32
  }
}

module attributes {stable_mosaic.version = 11 : i64} {
  func.func @qkv_kernel(%arg0: i32, %arg1: i32, %arg2: memref<1x8x32xf32, #tpu.memory_space<vmem>>, %arg3: memref<1x32xf32, #tpu.memory_space<vmem>>, %arg4: memref<1x32xf32, #tpu.memory_space<vmem>>, %arg5: memref<32x32xbf16, #tpu.memory_space<vmem>>, %arg6: memref<1x32xf32, #tpu.memory_space<vmem>>, %arg7: memref<32x32xbf16, #tpu.memory_space<vmem>>, %arg8: memref<1x32xf32, #tpu.memory_space<vmem>>, %arg9: memref<32x32xbf16, #tpu.memory_space<vmem>>, %arg10: memref<1x32xf32, #tpu.memory_space<vmem>>, %arg11: memref<1x4x8x8xbf16, #tpu.memory_space<vmem>>, %arg12: memref<1x4x8x8xbf16, #tpu.memory_space<vmem>>, %arg13: memref<1x4x8x8xbf16, #tpu.memory_space<vmem>>) attributes {dimension_semantics = [#tpu.dimension_semantics<parallel>, #tpu.dimension_semantics<parallel>], iteration_bounds = array<i64: 2, 1>, scalar_prefetch = 0 : i64, scratch_operands = 0 : i64, tpu.core_type = #tpu.core_type<tc>, window_params = [{transform_indices = @transform_0, window_bounds = array<i64: 1, 8, 32>}, {pipeline_mode = #tpu.pipeline_mode<synchronous>, transform_indices = @transform_1, window_bounds = array<i64: 1, 32>}, {pipeline_mode = #tpu.pipeline_mode<synchronous>, transform_indices = @transform_2, window_bounds = array<i64: 1, 32>}, {pipeline_mode = #tpu.pipeline_mode<synchronous>, transform_indices = @transform_3, window_bounds = array<i64: 32, 32>}, {pipeline_mode = #tpu.pipeline_mode<synchronous>, transform_indices = @transform_4, window_bounds = array<i64: 1, 32>}, {pipeline_mode = #tpu.pipeline_mode<synchronous>, transform_indices = @transform_5, window_bounds = array<i64: 32, 32>}, {pipeline_mode = #tpu.pipeline_mode<synchronous>, transform_indices = @transform_6, window_bounds = array<i64: 1, 32>}, {pipeline_mode = #tpu.pipeline_mode<synchronous>, transform_indices = @transform_7, window_bounds = array<i64: 32, 32>}, {pipeline_mode = #tpu.pipeline_mode<synchronous>, transform_indices = @transform_8, window_bounds = array<i64: 1, 32>}, {transform_indices = @transform_9, window_bounds = array<i64: 1, 4, 8, 8>}, {transform_indices = @transform_10, window_bounds = array<i64: 1, 4, 8, 8>}, {transform_indices = @transform_11, window_bounds = array<i64: 1, 4, 8, 8>}]} {
    %c0 = arith.constant 0 : index
    %c0_0 = arith.constant 0 : index
    %c0_1 = arith.constant 0 : index
    %0 = vector.load %arg2[%c0, %c0_0, %c0_1] : memref<1x8x32xf32, #tpu.memory_space<vmem>>, vector<1x8x32xf32>
    %1 = vector.shape_cast %0 : vector<1x8x32xf32> to vector<8x32xf32>
    %c0_2 = arith.constant 0 : index
    %c0_3 = arith.constant 0 : index
    %2 = vector.load %arg3[%c0_2, %c0_3] : memref<1x32xf32, #tpu.memory_space<vmem>>, vector<1x32xf32>
    %c0_4 = arith.constant 0 : index
    %c0_5 = arith.constant 0 : index
    %3 = vector.load %arg4[%c0_4, %c0_5] : memref<1x32xf32, #tpu.memory_space<vmem>>, vector<1x32xf32>
    %cst = arith.constant dense<0.000000e+00> : vector<8xf32>
    %4 = vector.multi_reduction <add>, %1, %cst [1] : vector<8x32xf32> to vector<8xf32>
    %5 = vector.shape_cast %4 : vector<8xf32> to vector<8x1xf32>
    %cst_6 = arith.constant 3.200000e+01 : f32
    %6 = vector.broadcast %cst_6 : f32 to vector<8x1xf32>
    %7 = arith.divf %5, %6 : vector<8x1xf32>
    %8 = vector.broadcast %7 : vector<8x1xf32> to vector<8x32xf32>
    %9 = arith.subf %1, %8 : vector<8x32xf32>
    %10 = arith.mulf %9, %9 : vector<8x32xf32>
    %cst_7 = arith.constant dense<0.000000e+00> : vector<8xf32>
    %11 = vector.multi_reduction <add>, %10, %cst_7 [1] : vector<8x32xf32> to vector<8xf32>
    %12 = vector.shape_cast %11 : vector<8xf32> to vector<8x1xf32>
    %cst_8 = arith.constant 3.200000e+01 : f32
    %13 = vector.broadcast %cst_8 : f32 to vector<8x1xf32>
    %14 = arith.divf %12, %13 : vector<8x1xf32>
    %15 = vector.broadcast %7 : vector<8x1xf32> to vector<8x32xf32>
    %16 = arith.subf %1, %15 : vector<8x32xf32>
    %cst_9 = arith.constant 9.99999997E-7 : f32
    %17 = vector.broadcast %cst_9 : f32 to vector<8x1xf32>
    %18 = arith.addf %14, %17 : vector<8x1xf32>
    %19 = math.rsqrt %18 : vector<8x1xf32>
    %20 = vector.broadcast %19 : vector<8x1xf32> to vector<8x32xf32>
    %21 = arith.mulf %16, %20 : vector<8x32xf32>
    %22 = vector.broadcast %2 : vector<1x32xf32> to vector<8x32xf32>
    %23 = arith.mulf %21, %22 : vector<8x32xf32>
    %24 = vector.broadcast %3 : vector<1x32xf32> to vector<8x32xf32>
    %25 = arith.addf %23, %24 : vector<8x32xf32>
    %26 = arith.truncf %25 : vector<8x32xf32> to vector<8x32xbf16>
    %c0_10 = arith.constant 0 : index
    %c0_11 = arith.constant 0 : index
    %27 = vector.load %arg5[%c0_10, %c0_11] : memref<32x32xbf16, #tpu.memory_space<vmem>>, vector<32x32xbf16>
    %cst_12 = arith.constant dense<0.000000e+00> : vector<8x32xf32>
    %28 = tpu.matmul %26, %27, %cst_12 {dimension_numbers = #tpu.dot_dimension_numbers<[1], [0], [0], [1], [0, 0, 1, 1], [], []>} : vector<8x32xbf16>, vector<32x32xbf16>, vector<8x32xf32> -> vector<8x32xf32>
    %c0_13 = arith.constant 0 : index
    %c0_14 = arith.constant 0 : index
    %29 = vector.load %arg6[%c0_13, %c0_14] : memref<1x32xf32, #tpu.memory_space<vmem>>, vector<1x32xf32>
    %30 = vector.broadcast %29 : vector<1x32xf32> to vector<8x32xf32>
    %31 = arith.addf %28, %30 : vector<8x32xf32>
    %cst_15 = arith.constant 0.353553385 : f32
    %32 = vector.broadcast %cst_15 : f32 to vector<8x32xf32>
    %33 = arith.mulf %31, %32 : vector<8x32xf32>
    %c0_16 = arith.constant 0 : index
    %c0_17 = arith.constant 0 : index
    %34 = vector.load %arg7[%c0_16, %c0_17] : memref<32x32xbf16, #tpu.memory_space<vmem>>, vector<32x32xbf16>
    %cst_18 = arith.constant dense<0.000000e+00> : vector<8x32xf32>
    %35 = tpu.matmul %26, %34, %cst_18 {dimension_numbers = #tpu.dot_dimension_numbers<[1], [0], [0], [1], [0, 0, 1, 1], [], []>} : vector<8x32xbf16>, vector<32x32xbf16>, vector<8x32xf32> -> vector<8x32xf32>
    %c0_19 = arith.constant 0 : index
    %c0_20 = arith.constant 0 : index
    %36 = vector.load %arg8[%c0_19, %c0_20] : memref<1x32xf32, #tpu.memory_space<vmem>>, vector<1x32xf32>
    %37 = vector.broadcast %36 : vector<1x32xf32> to vector<8x32xf32>
    %38 = arith.addf %35, %37 : vector<8x32xf32>
    %c0_21 = arith.constant 0 : index
    %c0_22 = arith.constant 0 : index
    %39 = vector.load %arg9[%c0_21, %c0_22] : memref<32x32xbf16, #tpu.memory_space<vmem>>, vector<32x32xbf16>
    %cst_23 = arith.constant dense<0.000000e+00> : vector<8x32xf32>
    %40 = tpu.matmul %26, %39, %cst_23 {dimension_numbers = #tpu.dot_dimension_numbers<[1], [0], [0], [1], [0, 0, 1, 1], [], []>} : vector<8x32xbf16>, vector<32x32xbf16>, vector<8x32xf32> -> vector<8x32xf32>
    %c0_24 = arith.constant 0 : index
    %c0_25 = arith.constant 0 : index
    %41 = vector.load %arg10[%c0_24, %c0_25] : memref<1x32xf32, #tpu.memory_space<vmem>>, vector<1x32xf32>
    %42 = vector.broadcast %41 : vector<1x32xf32> to vector<8x32xf32>
    %43 = arith.addf %40, %42 : vector<8x32xf32>
    %44 = vector.shape_cast %33 : vector<8x32xf32> to vector<8x4x8xf32>
    %45 = tpu.transpose %44, [1, 0, 2] : vector<8x4x8xf32> -> vector<4x8x8xf32>
    %46 = arith.truncf %45 : vector<4x8x8xf32> to vector<4x8x8xbf16>
    %c0_26 = arith.constant 0 : index
    %c0_27 = arith.constant 0 : index
    %c0_28 = arith.constant 0 : index
    %c0_29 = arith.constant 0 : index
    %47 = vector.load %arg11[%c0_26, %c0_27, %c0_28, %c0_29] : memref<1x4x8x8xbf16, #tpu.memory_space<vmem>>, vector<1x4x8x8xbf16>
    %48 = vector.shape_cast %47 : vector<1x4x8x8xbf16> to vector<4x8x8xbf16>
    %49 = vector.shape_cast %46 : vector<4x8x8xbf16> to vector<1x4x8x8xbf16>
    tpu.vector_store %arg11[%c0_26, %c0_27, %c0_28, %c0_29], %49 {strides = array<i32>} : memref<1x4x8x8xbf16, #tpu.memory_space<vmem>>, vector<1x4x8x8xbf16>,
    %50 = vector.shape_cast %38 : vector<8x32xf32> to vector<8x4x8xf32>
    %51 = tpu.transpose %50, [1, 0, 2] : vector<8x4x8xf32> -> vector<4x8x8xf32>
    %52 = arith.truncf %51 : vector<4x8x8xf32> to vector<4x8x8xbf16>
    %c0_30 = arith.constant 0 : index
    %c0_31 = arith.constant 0 : index
    %c0_32 = arith.constant 0 : index
    %c0_33 = arith.constant 0 : index
    %53 = vector.load %arg12[%c0_30, %c0_31, %c0_32, %c0_33] : memref<1x4x8x8xbf16, #tpu.memory_space<vmem>>, vector<1x4x8x8xbf16>
    %54 = vector.shape_cast %53 : vector<1x4x8x8xbf16> to vector<4x8x8xbf16>
    %55 = vector.shape_cast %52 : vector<4x8x8xbf16> to vector<1x4x8x8xbf16>
    tpu.vector_store %arg12[%c0_30, %c0_31, %c0_32, %c0_33], %55 {strides = array<i32>} : memref<1x4x8x8xbf16, #tpu.memory_space<vmem>>, vector<1x4x8x8xbf16>,
    %56 = vector.shape_cast %43 : vector<8x32xf32> to vector<8x4x8xf32>
    %57 = tpu.transpose %56, [1, 0, 2] : vector<8x4x8xf32> -> vector<4x8x8xf32>
    %58 = arith.truncf %57 : vector<4x8x8xf32> to vector<4x8x8xbf16>
    %c0_34 = arith.constant 0 : index
    %c0_35 = arith.constant 0 : index
    %c0_36 = arith.constant 0 : index
    %c0_37 = arith.constant 0 : index
    %59 = vector.load %arg13[%c0_34, %c0_35, %c0_36, %c0_37] : memref<1x4x8x8xbf16, #tpu.memory_space<vmem>>, vector<1x4x8x8xbf16>
    %60 = vector.shape_cast %59 : vector<1x4x8x8xbf16> to vector<4x8x8xbf16>
    %61 = vector.shape_cast %58 : vector<4x8x8xbf16> to vector<1x4x8x8xbf16>
    tpu.vector_store %arg13[%c0_34, %c0_35, %c0_36, %c0_37], %61 {strides = array<i32>} : memref<1x4x8x8xbf16, #tpu.memory_space<vmem>>, vector<1x4x8x8xbf16>,
    return
  }
  func.func @transform_0(%arg0: i32, %arg1: i32) -> (i32, i32, i32) {
    %c0_i32 = arith.constant 0 : i32
    %c0_i32_0 = arith.constant 0 : i32
    return %arg0, %arg1, %c0_i32 : i32, i32, i32
  }
  func.func @transform_1(%arg0: i32, %arg1: i32) -> (i32, i32) {
    %c0_i32 = arith.constant 0 : i32
    %c0_i32_0 = arith.constant 0 : i32
    %c0_i32_1 = arith.constant 0 : i32
    return %c0_i32, %c0_i32_0 : i32, i32
  }
  func.func @transform_2(%arg0: i32, %arg1: i32) -> (i32, i32) {
    %c0_i32 = arith.constant 0 : i32
    %c0_i32_0 = arith.constant 0 : i32
    %c0_i32_1 = arith.constant 0 : i32
    return %c0_i32, %c0_i32_0 : i32, i32
  }
  func.func @transform_3(%arg0: i32, %arg1: i32) -> (i32, i32) {
    %c0_i32 = arith.constant 0 : i32
    %c0_i32_0 = arith.constant 0 : i32
    %c0_i32_1 = arith.constant 0 : i32
    return %c0_i32, %c0_i32_0 : i32, i32
  }
  func.func @transform_4(%arg0: i32, %arg1: i32) -> (i32, i32) {
    %c0_i32 = arith.constant 0 : i32
    %c0_i32_0 = arith.constant 0 : i32
    %c0_i32_1 = arith.constant 0 : i32
    return %c0_i32, %c0_i32_0 : i32, i32
  }
  func.func @transform_5(%arg0: i32, %arg1: i32) -> (i32, i32) {
    %c0_i32 = arith.constant 0 : i32
    %c0_i32_0 = arith.constant 0 : i32
    %c0_i32_1 = arith.constant 0 : i32
    return %c0_i32, %c0_i32_0 : i32, i32
  }
  func.func @transform_6(%arg0: i32, %arg1: i32) -> (i32, i32) {
    %c0_i32 = arith.constant 0 : i32
    %c0_i32_0 = arith.constant 0 : i32
    %c0_i32_1 = arith.constant 0 : i32
    return %c0_i32, %c0_i32_0 : i32, i32
  }
  func.func @transform_7(%arg0: i32, %arg1: i32) -> (i32, i32) {
    %c0_i32 = arith.constant 0 : i32
    %c0_i32_0 = arith.constant 0 : i32
    %c0_i32_1 = arith.constant 0 : i32
    return %c0_i32, %c0_i32_0 : i32, i32
  }
  func.func @transform_8(%arg0: i32, %arg1: i32) -> (i32, i32) {
    %c0_i32 = arith.constant 0 : i32
    %c0_i32_0 = arith.constant 0 : i32
    %c0_i32_1 = arith.constant 0 : i32
    return %c0_i32, %c0_i32_0 : i32, i32
  }
  func.func @transform_9(%arg0: i32, %arg1: i32) -> (i32, i32, i32, i32) {
    %c0_i32 = arith.constant 0 : i32
    %c0_i32_0 = arith.constant 0 : i32
    %c0_i32_1 = arith.constant 0 : i32
    return %arg0, %c0_i32, %arg1, %c0_i32_0 : i32, i32, i32, i32
  }
  func.func @transform_10(%arg0: i32, %arg1: i32) -> (i32, i32, i32, i32) {
    %c0_i32 = arith.constant 0 : i32
    %c0_i32_0 = arith.constant 0 : i32
    %c0_i32_1 = arith.constant 0 : i32
    return %arg0, %c0_i32, %arg1, %c0_i32_0 : i32, i32, i32, i32
  }
  func.func @transform_11(%arg0: i32, %arg1: i32) -> (i32, i32, i32, i32) {
    %c0_i32 = arith.constant 0 : i32
    %c0_i32_0 = arith.constant 0 : i32
    %c0_i32_1 = arith.constant 0 : i32
    return %arg0, %c0_i32, %arg1, %c0_i32_0 : i32, i32, i32, i32
  }
}

</mosaic_0001>

<bundles_post_ra>
// kernel: tpu_custom_call.1
= control target key start
LH: loop header
LB: loop body
LE: loop exit
PB: predicated region body
PF: predicated region fallthrough
CT: control target
= control target key end

     0   :  { %s2332_s0 = inlined_call_operand.hbm [shape: f32[2,8,32], index: 0, kind: input, shape index: {}]   ;;  %s2333_s1 = inlined_call_operand.vmem [shape: f32[1,32], index: 1, kind: input, shape index: {}]   ;;  %s2334_s2 = inlined_call_operand.vmem [shape: f32[1,32], index: 2, kind: input, shape index: {}]   ;;  %s2335_s3 = inlined_call_operand.hbm [shape: bf16[32,32], index: 3, kind: input, shape index: {}]   ;;  %s2336_s4 = inlined_call_operand.vmem [shape: f32[1,32], index: 4, kind: input, shape index: {}]   ;;  %s2337_s5 = inlined_call_operand.hbm [shape: bf16[32,32], index: 5, kind: input, shape index: {}]   ;;  %s2338_s6 = inlined_call_operand.vmem [shape: f32[1,32], index: 6, kind: input, shape index: {}]   ;;  %s2339_s7 = inlined_call_operand.hbm [shape: bf16[32,32], index: 7, kind: input, shape index: {}]   ;;  %s2340_s8 = inlined_call_operand.vmem [shape: f32[1,32], index: 8, kind: input, shape index: {}]   ;;  %s2341_s9 = inlined_call_operand.hbm [shape: bf16[2,4,8,8], index: 9, kind: output, shape index: {0}]   ;;  %s2342_s10 = inlined_call_operand.hbm [shape: bf16[2,4,8,8], index: 10, kind: output, shape index: {1}]   ;;  %s2343_s11 = inlined_call_operand.hbm [shape: bf16[2,4,8,8], index: 11, kind: output, shape index: {2}]  }
   0x1   :  { %2351 = sst [smem:[#allocation22_spill]] %s2335_s3 }
   0x2   :  { %2352 = sst [smem:[#allocation23_spill]] %s2337_s5 }
   0x3   :  { %2353 = sst [smem:[#allocation24_spill]] %s2339_s7 }
   0x4   :  { %2354 = sst [smem:[#allocation25_spill]] %s2343_s11 }
   0x5   :  { %17 = vsyncpa [#allocation3], 0 }
   0x6   :  { %19 = vsyncpa [#allocation3 + $0x1], 0 }
   0x7   :  { %20 = vsyncpa [#allocation6], 0 }
   0x8   :  { %21 = vsyncpa [#allocation9], 0 }
   0x9   :  { %22 = vsyncpa [#allocation4], 0 }
   0xa   :  { %24 = vsyncpa [#allocation4 + $0x1], 0 }
   0xb   :  { %25 = vsyncpa [#allocation12], 0 }
   0xc   :  { %27 = vsyncpa [#allocation12 + $0x1], 0  ;;  %s1948_s17 = smov 0   ;;  %s1950_s18 = smov 0  }
   0xd   :  { %s1952_s19 = smov 0   ;;  %s1954_s20 = smov 0  }
   0xe   :  { %s1956_s21 = smov 0   ;;  %s1958_s22 = smov 0  }
   0xf LB: > { %2355 = sst [smem:[#allocation19_spill]] %s1848_s17  ;;  %s1979_s23 = sadd.s32 4294967295, %s1868_s22   ;;  %s1868_s22 = sphi %s1958_s22, %s33_s22   ;;  %s1864_s21 = sphi %s1956_s21, %s2384_s21   ;;  %s1860_s20 = sphi %s1954_s20, %s2383_s20   ;;  %s1856_s19 = sphi %s1952_s19, %s2382_s19   ;;  %s1852_s18 = sphi %s1950_s18, %s2381_s18   ;;  %s1848_s17 = sphi %s1948_s17, %s2380_s17  }
  0x10   : > { %s2344_s24 = sadd.s32 4294967294, %s1868_s22   ;;  %p67_p0 = scmp.ne.s32.totalorder %s1852_s18, %s1848_s17 }
  0x11   : > { %p2346_p1 = scmp.eq.s32.totalorder %s1979_s23, 0  ;;  %p267_p3 = scmp.eq.s32.totalorder %s2344_s24, 1 }
  0x12   : > { %p1414_p5 = scmp.ge.s32.totalorder %s1868_s22, 1  ;;  %p330_p7 = scmp.lt.s32.totalorder %s1868_s22, 3 }
  0x13   : > { %p1990_p4 = por %p2346_p1, %p67_p0  ;;  %p1995_p6 = por %p267_p3, %p67_p0 }
  0x14   : > { %p2000_p8 = pnand %p1414_p5, %p330_p7  ;;  %s1870_s28 = smov [#allocation5]  }
  0x15   : > { %s2356_s25 = scalar_select %p1990_p4, 1, 0 }
  0x16   : > { %s2357_s26 = scalar_select %p1995_p6, 1, 0 }
  0x17   : > { %s348_s29 = sshll.u32 %s1870_s28, 4  ;;  %p1516_p9 = pneg %p2000_p8  ;;  %s349_s29 = int_to_ptr.vmem [resolvable:$true] %s348_s29 }
  0x18   : > { %2358 = sst [smem:[#allocation20_spill]] %s2357_s26  ;;  %s1871_s12 = smov [#allocation7]  }
  0x19   : > { %p2009_p11 = pnand %p1516_p9, %p2346_p1  ;;  %s364_s13 = sshll.u32 %s1871_s12, 4  ;;  %s365_s13 = int_to_ptr.vmem [resolvable:$true] %s364_s13 }
  0x1a   : > { %s1872_s14 = smov [#allocation8]   ;;  %s1629_s16 = scalar_lea.vmem %s349_s29, 256 }
  0x1b   : > { %s380_s15 = sshll.u32 %s1872_s14, 4  ;;  %p1620_p12 = pneg %p2009_p11  ;;  %s381_s15 = int_to_ptr.vmem [resolvable:$true] %s380_s15 }
  0x1c   : > { %p1630_p13 = scmp.ne.s32.totalorder %s349_s29, %s1629_s16  ;;  %p1637_p5 = scmp.lt.s32.totalorder %s349_s29, %s349_s29 }
  0x1d   : > { %p1638_p7 = scmp.lt.s32.totalorder %s1629_s16, %s1629_s16 }
  0x1e   : > { %p1632_p0 = pnand %p1630_p13, %p1620_p12 }
  0x1f   : > { %p1639_p9 = por %p1638_p7, %p1637_p5 }
  0x20   : > { %p1633_p3 = pneg %p1632_p0 }
  0x22   : > { %p1640_p10 = pnand %p1639_p9, %p1633_p3 }
  0x24   : > { %1643 = shalt.err (!%p1640_p10)
}
  0x25   : > { %s1873_s28 = smov 64   ;;  %s1874_s12 = smov 4  }
  0x26   : > { %s2361_s3 = sld [smem:[#allocation22_spill]]  ;;  %s1655_s26 = scalar_lea.vmem %s365_s13, 256 }
  0x27   : > { %p1656_p1 = scmp.ne.s32.totalorder %s365_s13, %s1655_s26  ;;  %p1663_p2 = scmp.lt.s32.totalorder %s365_s13, %s365_s13 }
  0x28   : > { %p1664_p6 = scmp.lt.s32.totalorder %s1655_s26, %s1655_s26 }
  0x29   : > { %p1658_p13 = pnand %p1656_p1, %p1620_p12 }
  0x2a   : > { %p1665_p5 = por %p1664_p6, %p1663_p2 }
  0x2b   : > { %p1659_p0 = pneg %p1658_p13 }
  0x2c   : > { %1519 = dma.hbm_to_vmem [thread:$0]  (!%p2009_p11), %s2361_s3, 256, %s349_s29, [#allocation6], %s1873_s28, %s1873_s28, %s1874_s12  }
  0x2d   : > { %p1666_p3 = pnand %p1665_p5, %p1659_p0 }
  0x2f   : > { %1669 = shalt.err (!%p1666_p3)
}
  0x30   : > { %s2362_s5 = sld [smem:[#allocation23_spill]]  ;;  %s1681_s24 = scalar_lea.vmem %s381_s15, 256 }
  0x31   : > { %p1682_p10 = scmp.ne.s32.totalorder %s381_s15, %s1681_s24  ;;  %p1689_p9 = scmp.lt.s32.totalorder %s381_s15, %s381_s15 }
  0x32   : > { %p1690_p13 = scmp.lt.s32.totalorder %s1681_s24, %s1681_s24 }
  0x33   : > { %p1684_p7 = pnand %p1682_p10, %p1620_p12 }
  0x34   : > { %p1691_p4 = por %p1690_p13, %p1689_p9 }
  0x35   : > { %p1685_p1 = pneg %p1684_p7 }
  0x36   : > { %1522 = dma.hbm_to_vmem [thread:$0]  (!%p2009_p11), %s2362_s5, 256, %s365_s13, [#allocation6], %s1873_s28, %s1873_s28, %s1874_s12  }
  0x37   : > { %p1692_p2 = pnand %p1691_p4, %p1685_p1 }
  0x39   : > { %1695 = shalt.err (!%p1692_p2)
}
  0x3a   : > { %s2363_s7 = sld [smem:[#allocation24_spill]]  ;;  %s54_s17 = sadd.s32 1, %s1856_s19 }
  0x3b   : > { %s45_s13 = sadd.s32 1, %s1864_s21  ;;  %p61_p4 = scmp.ne.s32.totalorder %s1856_s19, %s1852_s18 }
  0x3c   : > { %p47_p6 = scmp.ge.s32.totalorder %s45_s13, 2  ;;  %p62_p12 = scmp.eq.s32.totalorder %s1868_s22, 0 }
  0x3d   : > { %p2364_p0 = scmp.eq.s32.totalorder %s1979_s23, 1  ;;  %p1543_p3 = scmp.lt.s32.totalorder %s1868_s22, 2 }
  0x3e   : > { %s2386_s13 = smov (%p47_p6, %s45_s13), 0  ;;  %p63_p10 = por %p62_p12, %p61_p4 }
  0x3f   : > { %p2046_p5 = por %p2364_p0, %p61_p4  ;;  %2366 = sst [smem:[#allocation21_spill]] %s2386_s13 }
  0x40   : > { %1525 = dma.hbm_to_vmem [thread:$0]  (!%p2009_p11), %s2363_s7, 256, %s381_s15, [#allocation9], %s1873_s28, %s1873_s28, %s1874_s12  }
  0x41   : > { %s397_s14 = sand.u32 1, %s1856_s19   ;;  %s49_s16 = ssub.s32 %s1864_s21, %s2386_s13 }
  0x42   : > { %p52_p7 = scmp.eq.s32.totalorder %s49_s16, 0  ;;  %s1419_s15 = sshll.u32 %s397_s14, 3 }
  0x43   : > { %s1420_s28 = sshll.u32 %s1864_s21, 7  ;;  %s401_s3 = scalar_lea.vmem [#allocation2], %s1419_s15 }
  0x44   : > { %s2058_s12 = scalar_select %p52_p7, %s1856_s19, %s54_s17  }
  0x45   : > { %s407_s29 = scalar_lea.hbm %s2332_s0, %s1420_s28  ;;  %s409_s5 = sshll.u32 %s401_s3, 4  ;;  %s410_s5 = int_to_ptr.vmem [resolvable:$true] %s409_s5 }
  0x46   : > { %p2065_p11 = pnand %p1543_p3, %p63_p10  ;;  %s398_s11 = scalar_lea.sflag [#allocation3], %s397_s14 }
  0x47   : > { %s1709_s16 = scalar_lea.vmem %s410_s5, 128  ;;  %s1875_s17 = smov [#allocation2]  }
  0x48   : > { %p1698_p1 = pneg %p2065_p11  ;;  %p1710_p9 = scmp.ne.s32.totalorder %s410_s5, %s1709_s16 }
  0x49   : > { %s1714_s13 = sshll.u32 %s1875_s17, 4  ;;  %s1715_s13 = int_to_ptr.vmem [resolvable:$false] %s1714_s13 }
  0x4a   : > { %p1712_p13 = pnand %p1710_p9, %p1698_p1  ;;  %s1716_s28 = scalar_lea.vmem %s1715_s13, 256 }
  0x4b   : > { %p1717_p4 = scmp.lt.s32.totalorder %s410_s5, %s1715_s13  ;;  %p1718_p6 = scmp.lt.s32.totalorder %s1716_s28, %s1709_s16 }
  0x4c   : > { %p1713_p2 = pneg %p1712_p13 }
  0x4d   : > { %p1719_p12 = por %p1718_p6, %p1717_p4 }
  0x4f   : > { %p1720_p0 = pnand %p1719_p12, %p1713_p2 }
  0x51   : > { %1723 = shalt.err (!%p1720_p0)
}
  0x52   : > { %1529 = dma.hbm_to_vmem [thread:$0]  (!%p2065_p11), %s407_s29, 128, %s410_s5, %s398_s11  }
  0x53   : > { %418 = sbr.rel (%p2000_p8) target bundleno = 808 (0x328), region = 56  ;;  %s2076_s3 = sand.u32 (!%p2000_p8), 1, %s1852_s18  }
  0x54   : > { %s1422_s14 = sshll.u32 (!%p2000_p8), %s2076_s3, 3  ;;  %s421_s15 = scalar_lea.sflag (!%p2000_p8), [#allocation3], %s2076_s3 }
  0x55   : > { %s424_s24 = scalar_lea.vmem (!%p2000_p8), [#allocation2], %s1422_s14  ;;  %p2368_p3 = scmp.ne.s32.totalorder (!%p2000_p8), %s2356_s25, 0 }
  0x58   : > { %1827 = dma.done.wait (%p2368_p3), %s421_s15, 128  }
  0x59   : > { %1829 = vsyncadd (%p2368_p3), %s421_s15, 4294967168  ;;  %p2369_p10 = scmp.eq.s32.totalorder %s1979_s23, 0 }
  0x5b   : > { %1831 = dma.done.wait (%p2369_p10), [#allocation6], 512   ;;  %p2370_p7 = pmov %p2369_p10 }
  0x5d   : > { %1833 = vsyncadd (%p2370_p7), [#allocation6], 4294966784  ;;  %p2371_p8 = pmov %p2370_p7 }
  0x5e   : > { %p2372_p11 = pmov %p2370_p7 }
  0x5f   : > { %1835 = dma.done.wait (%p2371_p8), [#allocation9], 256  }
  0x60   : > { %1837 = vsyncadd (%p2372_p11), [#allocation9], 4294967040  ;;  %vm489_vm0 = vcmask 261120   ;;  %v486_v0 = vld [vmem:[%s424_s24] sm:$0xff]  ;;  %v1610_v7 = vld [vmem:[#allocation5 + $0x8] sm:$0xff]   ;;  %v1876_v9 = vmov 0.0   ;;  %v727_v45 = vlaneseq }
  0x61   : > { %v490_v1 = vsel %vm489_vm0, %v486_v0, 0.0  ;;  %v1611_v8 = vld [vmem:[#allocation7 + $0x8] sm:$0xff]   ;;  %1472 = vmatprep.subr.bf16.mxu0 %v1876_v9  ;;  %1480 = vmatprep.subr.bf16.mxu1 %v1876_v9  ;;  %v1612_v10 = vld [vmem:[#allocation5] sm:$0xff]   ;;  %v1613_v11 = vld [vmem:[#allocation7] sm:$0xff]   ;;  %vm1877_vm1 = vmmov 0   ;;  %s1878_s16 = smov 104  }
  0x62   : > { %491 = vadd.xlane.f32.xlu0 %v490_v1  ;;  %1473 = vmatpush3.bf16.msra.mxu0 %v1610_v7  ;;  %v1429_v16 = vld [vmem:[%s2333_s1] ss:$0 sm:$0xff]  ;;  %v1614_v21 = vld [vmem:[#allocation8 + $0x8] sm:$0xff]   ;;  %v1615_v23 = vld [vmem:[#allocation8] sm:$0xff]   ;;  %s1879_s17 = smov 120   ;;  %s1880_s28 = smov 112  }
  0x63   : > { %1481 = vmatpush3.bf16.msra.mxu1 %v1611_v8  ;;  %1474 = vmatprep.subr.bf16.mxu0 %v1876_v9  ;;  %v1430_v18 = vld [vmem:[%s2334_s2] ss:$0 sm:$0xff]  ;;  %v1881_v43 = vmov 1983009808   ;;  %v1882_v46 = vmov 1934713408  }
  0x64   : > { %1482 = vmatprep.subr.bf16.mxu1 %v1876_v9  ;;  %1476 = vmatprep.mubr.msk.bf16.mxu0 %vm1877_vm1, %v1876_v9  ;;  %v1435_v24 = vld [vmem:[%s2338_s6] ss:$0 sm:$0xff]  ;;  %v725_v44 = vunpack.c.l.s4 %v1881_v43  ;;  %v757_v47 = vunpack.c.l.s4 %v1882_v46  ;;  %v728_v49 = vshrl.u32 %v727_v45, 7  ;;  %s2144_s24 = sshll.u32 %s2076_s3, 4  ;;  %vm862_vm2 = vcmask 60416   ;;  %s1180_s5 = sand.u32 1, %s1979_s23  }
  0x65   : > { %1484 = vmatprep.mubr.msk.bf16.mxu1 %vm1877_vm1, %v1876_v9  ;;  %v1431_v28 = vld [vmem:[%s2336_s4] ss:$0 sm:$0xff]  ;;  %s2158_s7 = sshll.u32 %s1860_s20, 8  ;;  %s477_s11 = scalar_lea.vmem [#allocation11], %s2144_s24 }
  0x66   : > { %1475 = vmatpush3.bf16.msra.mxu0 %v1612_v10  ;;  %v1439_v41 = vld [vmem:[%s2340_s8] ss:$0 sm:$0xff]  ;;  %v726_v48 = vunpack.c.0.s8 %v725_v44  ;;  %v758_v52 = vunpack.c.0.s8 %v757_v47  ;;  %s1217_s25 = sshll.u32 %s477_s11, 4  ;;  %s2165_s20 = scalar_lea.hbm %s2342_s10, %s2158_s7  ;;  %s2167_s25 = int_to_ptr.vmem [resolvable:$true] %s1217_s25 }
  0x67   : > { %1483 = vmatpush3.bf16.msra.mxu1 %v1613_v11  ;;  %1488 = vmatprep.subr.bf16.mxu0 %v1876_v9  ;;  %s2179_s26 = scalar_lea.sflag [#allocation12], %s1180_s5  ;;  %s1724_s29 = scalar_lea.vmem %s2167_s25, 256 }
  0x68   : > { %v2125_v53 = vsub.s32 %v726_v48, %v728_v49  ;;  %v2127_v59 = vsub.s32 %v758_v52, %v728_v49  ;;  %p1725_p1 = scmp.ne.s32.totalorder %s2167_s25, %s1724_s29 }
  0x6a   : > { %p1726_p9 = pnand %p1725_p1, %p2046_p5 }
  0x6c   : > { %p1727_p13 = pneg %p1726_p9 }
  0xeb   : > { %v492_v2 = vpop.xlane.xlu0 %491 }
  0xec   : > { %v494_v3 = vmul.f32 0.03125, %v492_v2 }
  0xee   : > { %v495_v4 = vsub.f32 %v486_v0, %v494_v3 }
  0xf0   : > { %v496_v5 = vmul.f32 %v495_v4, %v495_v4 }
  0xf2   : > { %v497_v6 = vsel %vm489_vm0, %v496_v5, 0.0 }
  0xf3   : > { %498 = vadd.xlane.f32.xlu0 %v497_v6 }
 0x17c   : > { %v499_v12 = vpop.xlane.xlu0 %498 }
 0x17d   : > { %v500_v13 = vmul.f32 0.03125, %v499_v12 }
 0x17f   : > { %v501_v14 = vadd.f32 1e-06, %v500_v13 }
 0x181   : > { %1616 = vrsqrt.f32 %v501_v14 }
 0x18e   : > { %v1617_v15 = vpop.eup %1616 }
 0x18f   : > { %v503_v17 = vmul.f32 %v1617_v15, %v495_v4 }
 0x191   : > { %v510_v19 = vmul.f32 %v1429_v16, %v503_v17 }
 0x193   : > { %v517_v20 = vadd.f32 %v1430_v18, %v510_v19 }
 0x195   : > { %v518_v22 = vpack.c.bf16 %v517_v20, %v517_v20 }
 0x197   : > { %1477 = vmatmul.mubr.msk.bf16.vlgmr.msra.gmra.mxu0 %vm489_vm0, %v518_v22  ;;  %1485 = vmatmul.mubr.msk.bf16.vlgmr.msra.gmra.mxu1 %vm489_vm0, %v518_v22 }
 0x198   : > { %1489 = vmatpush3.bf16.msra.mxu0 %v1614_v21  ;;  %1492 = vmatprep.mubr.msk.bf16.mxu0 %vm1877_vm1, %v1876_v9 }
 0x199   : > { %1490 = vmatprep.subr.bf16.mxu0 %v1876_v9 }
 0x19c   : > { %1491 = vmatpush3.bf16.msra.mxu0 %v1615_v23 }
 0x19f   : > { %1493 = vmatmul.mubr.msk.bf16.vlgmr.msra.gmra.mxu0 %vm489_vm0, %v518_v22 }
 0x257   : > { %v579_v25 = vpop.f32.mrf.mxu0  ;;  %v643_v26 = vpop.f32.mrf.mxu1 }
 0x258   : > { %v644_v27 = vadd.f32 %v1435_v24, %v643_v26  ;;  %v580_v33 = vadd.f32 %v1431_v28, %v579_v25 }
 0x259   : > { %v1478_v29 = vpop.f32.mrf.mxu0  ;;  %v1486_v30 = vpop.f32.mrf.mxu1 }
 0x25a   : > { %874 = vrot.lane.b32.xlu0 %v644_v27, %s1878_s16  ;;  %868 = vrot.lane.b32.xlu1 %v644_v27, %s1879_s17  ;;  %v2112_v37 = vmul.f32 0.35355338, %v580_v33 }
 0x25b   : > { %v582_v31 = vpop.f32.mrf.mxu0  ;;  %v646_v32 = vpop.f32.mrf.mxu1 }
 0x25d   : > { %v1479_v34 = vpop.f32.mrf.mxu0  ;;  %v1487_v35 = vpop.f32.mrf.mxu1 }
 0x25e   : > { %871 = vrot.lane.b32.xlu1 %v644_v27, %s1880_s28 }
 0x25f   : > { %v706_v36 = vpop.f32.mrf.mxu0 }
 0x260   : > { %v2120_v42 = vadd.f32 %v1439_v41, %v706_v36 }
 0x261   : > { %v1494_v38 = vpop.f32.mrf.mxu0 }
 0x262   : > { %713 = vrot.lane.b32.xlu1 %v2112_v37, %s1879_s17 }
 0x263   : > { %v709_v39 = vpop.f32.mrf.mxu0 }
 0x265   : > { %v1495_v40 = vpop.f32.mrf.mxu0 }
 0x266   : > { %716 = vrot.lane.b32.xlu1 %v2112_v37, %s1880_s28 }
 0x26a   : > { %719 = vrot.lane.b32.xlu1 %v2112_v37, %s1878_s16 }
 0x26e   : > { %1022 = vrot.lane.b32.xlu1 %v2120_v42, %s1879_s17 }
 0x272   : > { %1025 = vrot.lane.b32.xlu1 %v2120_v42, %s1880_s28 }
 0x276   : > { %1028 = vrot.lane.b32.xlu1 %v2120_v42, %s1878_s16  ;;  %s1883_s16 = smov [#allocation11]  }
 0x277   : > { %s1728_s17 = sshll.u32 %s1883_s16, 4  ;;  %s1729_s17 = int_to_ptr.vmem [resolvable:$false] %s1728_s17 }
 0x278   : > { %s1730_s28 = scalar_lea.vmem %s1729_s17, 512  ;;  %p1731_p2 = scmp.lt.s32.totalorder %s2167_s25, %s1729_s17 }
 0x279   : > { %p1732_p4 = scmp.lt.s32.totalorder %s1730_s28, %s1724_s29 }
 0x27b   : > { %p1733_p6 = por %p1732_p4, %p1731_p2 }
 0x27d   : > { %p1734_p12 = pnand %p1733_p6, %p1727_p13 }
 0x2cc   : > { %v875_v50 = vpop.permute.xlu0 %874  ;;  %v869_v51 = vpop.permute.xlu1 %868 }
 0x2cd   : > { %v893_v54 = vcombine.low %v869_v51, %v875_v50  ;;  %v894_v55 = vcombine.high %v869_v51, %v875_v50 }
 0x2cf   : > { %v901_v60 = vrot.slane %v893_v54, %v2125_v53  ;;  %v908_v61 = vrot.slane %v894_v55, %v2125_v53 }
 0x2d0   : > { %v872_v56 = vpop.permute.xlu1 %871 }
 0x2d1   : > { %v877_v57 = vcombine.low %v644_v27, %v872_v56  ;;  %v878_v58 = vcombine.high %v644_v27, %v872_v56 }
 0x2d3   : > { %v885_v62 = vrot.slane %v877_v57, %v2125_v53  ;;  %v892_v63 = vrot.slane %v878_v58, %v2125_v53 }
 0x2d4   : > { %v714_v0 = vpop.permute.xlu1 %713 }
 0x2d5   : > { %v909_v1 = vcombine.low %v885_v62, %v901_v60  ;;  %v910_v2 = vcombine.high %v885_v62, %v901_v60  ;;  %v925_v3 = vcombine.low %v892_v63, %v908_v61  ;;  %v926_v4 = vcombine.high %v892_v63, %v908_v61 }
 0x2d7   : > { %v917_v5 = vrot.slane %v909_v1, %v2127_v59  ;;  %v924_v6 = vrot.slane %v910_v2, %v2127_v59  ;;  %v933_v7 = vrot.slane %v925_v3, %v2127_v59  ;;  %v940_v8 = vrot.slane %v926_v4, %v2127_v59 }
 0x2d8   : > { %v717_v9 = vpop.permute.xlu1 %716 }
 0x2d9   : > { %v945_v10 = vcombine.low %v917_v5, %v924_v6  ;;  %v1445_v11 = vcombine.high %v917_v5, %v924_v6  ;;  %v961_v12 = vcombine.low %v933_v7, %v940_v8  ;;  %v1446_v13 = vcombine.high %v933_v7, %v940_v8 }
 0x2da   : > { %v722_v18 = vcombine.low %v2112_v37, %v717_v9  ;;  %v723_v19 = vcombine.high %v2112_v37, %v717_v9 }
 0x2db   : > { %v952_v14 = vrot.slane %v945_v10, %v2125_v53  ;;  %v960_v15 = vrot.slane %v1445_v11, %v2125_v53  ;;  %v968_v16 = vrot.slane %v961_v12, %v2125_v53  ;;  %v976_v17 = vrot.slane %v1446_v13, %v2125_v53 }
 0x2dc   : > { %v720_v20 = vpop.permute.xlu1 %719  ;;  %v730_v31 = vrot.slane %v722_v18, %v2125_v53  ;;  %v737_v32 = vrot.slane %v723_v19, %v2125_v53 }
 0x2dd   : > { %v977_v21 = vcombine.low %v952_v14, %v960_v15  ;;  %v978_v22 = vcombine.high %v952_v14, %v960_v15  ;;  %v993_v23 = vcombine.low %v968_v16, %v976_v17  ;;  %v994_v24 = vcombine.high %v968_v16, %v976_v17 }
 0x2de   : > { %v738_v25 = vcombine.low %v714_v0, %v720_v20  ;;  %v739_v26 = vcombine.high %v714_v0, %v720_v20 }
 0x2df   : > { %v985_v27 = vrot.slane %v977_v21, %v2127_v59  ;;  %v992_v28 = vrot.slane %v978_v22, %v2127_v59  ;;  %v1001_v29 = vrot.slane %v993_v23, %v2127_v59  ;;  %v1008_v30 = vrot.slane %v994_v24, %v2127_v59 }
 0x2e0   : > { %v746_v33 = vrot.slane %v738_v25, %v2125_v53  ;;  %v753_v34 = vrot.slane %v739_v26, %v2125_v53  ;;  %v2155_v35 = vpop.permute.xlu1 %1022 }
 0x2e1   : > { %v1009_v36 = vcombine.low %v985_v27, %v1001_v29  ;;  %v1010_v37 = vcombine.high %v985_v27, %v1001_v29  ;;  %v1011_v38 = vcombine.low %v992_v28, %v1008_v30  ;;  %v1012_v39 = vcombine.high %v992_v28, %v1008_v30 }
 0x2e2   : > { %v754_v40 = vcombine.low %v730_v31, %v746_v33  ;;  %v755_v41 = vcombine.high %v730_v31, %v746_v33  ;;  %v770_v43 = vcombine.low %v737_v32, %v753_v34  ;;  %v771_v44 = vcombine.high %v737_v32, %v753_v34 }
 0x2e3   : > { %v1013_v45 = vpack.c.bf16 %v1009_v36, %v1009_v36  ;;  %v1014_v46 = vpack.c.bf16 %v1010_v37, %v1010_v37  ;;  %v1015_v47 = vpack.c.bf16 %v1011_v38, %v1011_v38  ;;  %v1016_v48 = vpack.c.bf16 %v1012_v39, %v1012_v39 }
 0x2e4   : > { %v762_v49 = vrot.slane %v754_v40, %v2127_v59  ;;  %v769_v50 = vrot.slane %v755_v41, %v2127_v59  ;;  %v778_v51 = vrot.slane %v770_v43, %v2127_v59  ;;  %v785_v52 = vrot.slane %v771_v44, %v2127_v59  ;;  %v1026_v54 = vpop.permute.xlu1 %1025 }
 0x2e5   : > { %1017 = vst.msk [vmem:[%s477_s11] sm:$0xf] %vm862_vm2, %v1013_v45  ;;  %1018 = vst.msk [vmem:[%s477_s11 + $0x4] sm:$0xf] %vm862_vm2, %v1014_v46 }
 0x2e6   : > { %1019 = vst.msk [vmem:[%s477_s11 + $0x8] sm:$0xf] %vm862_vm2, %v1015_v47  ;;  %1020 = vst.msk [vmem:[%s477_s11 + $0xc] sm:$0xf] %vm862_vm2, %v1016_v48  ;;  %v790_v55 = vcombine.low %v762_v49, %v769_v50  ;;  %v1443_v56 = vcombine.high %v762_v49, %v769_v50  ;;  %v806_v57 = vcombine.low %v778_v51, %v785_v52 }
 0x2e7   : > { %v1444_v58 = vcombine.high %v778_v51, %v785_v52 }
 0x2e8   : > { %1737 = shalt.err (!%p1734_p12)
}
 0x2e9   : > { %s1738_s23 = scalar_lea.hbm %s2165_s20, 256  ;;  %s1742_s5 = scalar_lea.hbm %s2342_s10, 512 }
 0x2ea   : > { %p1739_p0 = scmp.ne.s32.totalorder %s2165_s20, %s1738_s23  ;;  %p1743_p7 = scmp.lt.s32.totalorder %s2165_s20, %s2342_s10 }
 0x2eb   : > { %p1744_p8 = scmp.lt.s32.totalorder %s1742_s5, %s1738_s23 }
 0x2ec   : > { %p1740_p3 = pnand %p1739_p0, %p2046_p5 }
 0x2ed   : > { %p1745_p11 = por %p1744_p8, %p1743_p7 }
 0x2ee   : > { %p1741_p10 = pneg %p1740_p3 }
 0x2f0   : > { %p1746_p1 = pnand %p1745_p11, %p1741_p10 }
 0x2f2   : > { %1749 = shalt.err (!%p1746_p1)
}
 0x2f3   : > { %s1884_s13 = smov 64   ;;  %s1885_s29 = smov 4   ;;  %v1031_v60 = vcombine.low %v2120_v42, %v1026_v54  ;;  %v1032_v61 = vcombine.high %v2120_v42, %v1026_v54  ;;  %v797_v62 = vrot.slane %v790_v55, %v2125_v53  ;;  %v805_v63 = vrot.slane %v1443_v56, %v2125_v53  ;;  %v1029_v2 = vpop.permute.xlu1 %1028 }
 0x2f4   : > { %1511 = dma.vmem_to_hbm [thread:$0]  (%p2046_p5), %s2167_s25, 256, %s2165_s20, %s2179_s26, %s1884_s13, %s1884_s13, %s1885_s29   ;;  %v813_v0 = vrot.slane %v806_v57, %v2125_v53  ;;  %v821_v1 = vrot.slane %v1444_v58, %v2125_v53  ;;  %v1047_v3 = vcombine.low %v2155_v35, %v1029_v2  ;;  %v1048_v4 = vcombine.high %v2155_v35, %v1029_v2 }
 0x2f5   : > { %v822_v5 = vcombine.low %v797_v62, %v805_v63  ;;  %v823_v6 = vcombine.high %v797_v62, %v805_v63  ;;  %v1039_v42 = vrot.slane %v1031_v60, %v2125_v53  ;;  %v1046_v9 = vrot.slane %v1032_v61, %v2125_v53  ;;  %s470_s25 = scalar_lea.vmem [#allocation10], %s2144_s24  ;;  %s2230_s28 = scalar_lea.hbm %s2341_s9, %s2158_s7 }
 0x2f6   : > { %v838_v7 = vcombine.low %v813_v0, %v821_v1  ;;  %v839_v8 = vcombine.high %v813_v0, %v821_v1  ;;  %v1055_v10 = vrot.slane %v1047_v3, %v2125_v53  ;;  %v1062_v11 = vrot.slane %v1048_v4, %v2125_v53  ;;  %s1200_s20 = sshll.u32 %s470_s25, 4  ;;  %s1176_s23 = scalar_lea.sflag [#allocation4], %s2076_s3  ;;  %s2232_s20 = int_to_ptr.vmem [resolvable:$true] %s1200_s20 }
 0x2f7   : > { %v830_v12 = vrot.slane %v822_v5, %v2127_v59  ;;  %v837_v13 = vrot.slane %v823_v6, %v2127_v59  ;;  %s1750_s14 = scalar_lea.vmem %s2232_s20, 256  ;;  %s1886_s15 = smov [#allocation10]  }
 0x2f8   : > { %v846_v14 = vrot.slane %v838_v7, %v2127_v59  ;;  %v853_v15 = vrot.slane %v839_v8, %v2127_v59  ;;  %v1063_v16 = vcombine.low %v1039_v42, %v1055_v10  ;;  %v1064_v17 = vcombine.high %v1039_v42, %v1055_v10  ;;  %p1751_p9 = scmp.ne.s32.totalorder %s2232_s20, %s1750_s14  ;;  %s1754_s5 = sshll.u32 %s1886_s15, 4  ;;  %s1755_s5 = int_to_ptr.vmem [resolvable:$false] %s1754_s5 }
 0x2f9   : > { %v1079_v18 = vcombine.low %v1046_v9, %v1062_v11  ;;  %v1080_v19 = vcombine.high %v1046_v9, %v1062_v11  ;;  %s1756_s11 = scalar_lea.vmem %s1755_s5, 512  ;;  %p1757_p4 = scmp.lt.s32.totalorder %s2232_s20, %s1755_s5 }
 0x2fa   : > { %v854_v20 = vcombine.low %v830_v12, %v846_v14  ;;  %v855_v21 = vcombine.high %v830_v12, %v846_v14  ;;  %v856_v22 = vcombine.low %v837_v13, %v853_v15  ;;  %v857_v23 = vcombine.high %v837_v13, %v853_v15  ;;  %p1752_p13 = pnand %p1751_p9, %p2046_p5  ;;  %p1758_p6 = scmp.lt.s32.totalorder %s1756_s11, %s1750_s14 }
 0x2fb   : > { %v1071_v24 = vrot.slane %v1063_v16, %v2127_v59  ;;  %v1078_v25 = vrot.slane %v1064_v17, %v2127_v59  ;;  %v1087_v26 = vrot.slane %v1079_v18, %v2127_v59  ;;  %v1094_v27 = vrot.slane %v1080_v19, %v2127_v59 }
 0x2fc   : > { %v858_v28 = vpack.c.bf16 %v854_v20, %v854_v20  ;;  %v859_v29 = vpack.c.bf16 %v855_v21, %v855_v21  ;;  %v860_v30 = vpack.c.bf16 %v856_v22, %v856_v22  ;;  %v861_v31 = vpack.c.bf16 %v857_v23, %v857_v23  ;;  %p1753_p2 = pneg %p1752_p13  ;;  %p1759_p12 = por %p1758_p6, %p1757_p4 }
 0x2fd   : > { %v1099_v32 = vcombine.low %v1071_v24, %v1078_v25  ;;  %v1447_v33 = vcombine.high %v1071_v24, %v1078_v25  ;;  %v1115_v34 = vcombine.low %v1087_v26, %v1094_v27  ;;  %v1448_v35 = vcombine.high %v1087_v26, %v1094_v27 }
 0x2fe   : > { %863 = vst.msk [vmem:[%s470_s25] sm:$0xf] %vm862_vm2, %v858_v28  ;;  %864 = vst.msk [vmem:[%s470_s25 + $0x4] sm:$0xf] %vm862_vm2, %v859_v29  ;;  %p1760_p0 = pnand %p1759_p12, %p1753_p2 }
 0x2ff   : > { %865 = vst.msk [vmem:[%s470_s25 + $0x8] sm:$0xf] %vm862_vm2, %v860_v30  ;;  %866 = vst.msk [vmem:[%s470_s25 + $0xc] sm:$0xf] %vm862_vm2, %v861_v31  ;;  %v1106_v36 = vrot.slane %v1099_v32, %v2125_v53  ;;  %v1114_v37 = vrot.slane %v1447_v33, %v2125_v53  ;;  %v1122_v38 = vrot.slane %v1115_v34, %v2125_v53 }
 0x300   : > { %v1130_v39 = vrot.slane %v1448_v35, %v2125_v53 }
 0x301   : > { %1763 = shalt.err (!%p1760_p0)
}
 0x302   : > { %s1764_s27 = scalar_lea.hbm %s2230_s28, 256  ;;  %s1768_s16 = scalar_lea.hbm %s2341_s9, 512 }
 0x303   : > { %p1765_p3 = scmp.ne.s32.totalorder %s2230_s28, %s1764_s27  ;;  %p1769_p8 = scmp.lt.s32.totalorder %s2230_s28, %s2341_s9 }
 0x304   : > { %p1770_p11 = scmp.lt.s32.totalorder %s1768_s16, %s1764_s27 }
 0x305   : > { %p1766_p10 = pnand %p1765_p3, %p2046_p5 }
 0x306   : > { %p1771_p1 = por %p1770_p11, %p1769_p8 }
 0x307   : > { %p1767_p7 = pneg %p1766_p10 }
 0x309   : > { %p1772_p9 = pnand %p1771_p1, %p1767_p7 }
 0x30b   : > { %1775 = shalt.err (!%p1772_p9)
}
 0x30c   : > { %1510 = dma.vmem_to_hbm [thread:$0]  (%p2046_p5), %s2232_s20, 256, %s2230_s28, %s1176_s23, %s1884_s13, %s1884_s13, %s1885_s29   ;;  %v1131_v53 = vcombine.low %v1106_v36, %v1114_v37  ;;  %v1132_v40 = vcombine.high %v1106_v36, %v1114_v37  ;;  %v1147_v41 = vcombine.low %v1122_v38, %v1130_v39  ;;  %v1148_v43 = vcombine.high %v1122_v38, %v1130_v39 }
 0x30d   : > { %s484_s14 = scalar_lea.vmem [#allocation13], %s2144_s24  ;;  %s2373_s23 = sld [smem:[#allocation25_spill]] }
 0x30e   : > { %v1139_v44 = vrot.slane %v1131_v53, %v2127_v59  ;;  %v1146_v45 = vrot.slane %v1132_v40, %v2127_v59  ;;  %v1155_v46 = vrot.slane %v1147_v41, %v2127_v59  ;;  %v1162_v47 = vrot.slane %v1148_v43, %v2127_v59  ;;  %s1234_s5 = sshll.u32 %s484_s14, 4  ;;  %s2277_s5 = int_to_ptr.vmem [resolvable:$true] %s1234_s5 }
 0x30f   : > { %s1776_s24 = scalar_lea.vmem %s2277_s5, 256 }
 0x310   : > { %v1163_v48 = vcombine.low %v1139_v44, %v1155_v46  ;;  %v1164_v49 = vcombine.high %v1139_v44, %v1155_v46  ;;  %v1165_v50 = vcombine.low %v1146_v45, %v1162_v47  ;;  %v1166_v51 = vcombine.high %v1146_v45, %v1162_v47  ;;  %p1777_p13 = scmp.ne.s32.totalorder %s2277_s5, %s1776_s24 }
 0x312   : > { %v1167_v52 = vpack.c.bf16 %v1163_v48, %v1163_v48  ;;  %v1168_v54 = vpack.c.bf16 %v1164_v49, %v1164_v49  ;;  %v1169_v55 = vpack.c.bf16 %v1165_v50, %v1165_v50  ;;  %v1170_v56 = vpack.c.bf16 %v1166_v51, %v1166_v51  ;;  %p1778_p2 = pnand %p1777_p13, %p2046_p5 }
 0x313   : > { %s2275_s11 = scalar_lea.hbm %s2373_s23, %s2158_s7  ;;  %s1887_s7 = smov [#allocation13]  }
 0x314   : > { %1171 = vst.msk [vmem:[%s484_s14] sm:$0xf] %vm862_vm2, %v1167_v52  ;;  %1172 = vst.msk [vmem:[%s484_s14 + $0x4] sm:$0xf] %vm862_vm2, %v1168_v54  ;;  %p1779_p4 = pneg %p1778_p2  ;;  %s1780_s27 = sshll.u32 %s1887_s7, 4  ;;  %s1781_s27 = int_to_ptr.vmem [resolvable:$false] %s1780_s27 }
 0x315   : > { %1173 = vst.msk [vmem:[%s484_s14 + $0x8] sm:$0xf] %vm862_vm2, %v1169_v55  ;;  %1174 = vst.msk [vmem:[%s484_s14 + $0xc] sm:$0xf] %vm862_vm2, %v1170_v56  ;;  %s1782_s3 = scalar_lea.vmem %s1781_s27, 512  ;;  %p1783_p6 = scmp.lt.s32.totalorder %s2277_s5, %s1781_s27 }
 0x316   : > { %p1784_p12 = scmp.lt.s32.totalorder %s1782_s3, %s1776_s24 }
 0x318   : > { %p1785_p0 = por %p1784_p12, %p1783_p6 }
 0x31a   : > { %p1786_p3 = pnand %p1785_p0, %p1779_p4 }
 0x31c   : > { %1789 = shalt.err (!%p1786_p3)
}
 0x31d   : > { %s1790_s25 = scalar_lea.hbm %s2275_s11, 256  ;;  %s1794_s15 = scalar_lea.hbm %s2373_s23, 512 }
 0x31e   : > { %p1791_p10 = scmp.ne.s32.totalorder %s2275_s11, %s1790_s25  ;;  %p1795_p11 = scmp.lt.s32.totalorder %s2275_s11, %s2373_s23 }
 0x31f   : > { %p1796_p1 = scmp.lt.s32.totalorder %s1794_s15, %s1790_s25 }
 0x320   : > { %p1792_p7 = pnand %p1791_p10, %p2046_p5 }
 0x321   : > { %p1797_p9 = por %p1796_p1, %p1795_p11 }
 0x322   : > { %p1793_p8 = pneg %p1792_p7 }
 0x324   : > { %p1798_p13 = pnand %p1797_p9, %p1793_p8 }
 0x326   : > { %1801 = shalt.err (!%p1798_p13)
}
 0x327   : > { %1512 = dma.vmem_to_hbm [thread:$0]  (%p2046_p5), %s2277_s5, 256, %s2275_s11, %s2179_s26, %s1884_s13, %s1884_s13, %s1885_s29  }
 0x328 PF: > { %s2374_s28 = sld [smem:[#allocation19_spill]]  ;;  %p2377_p4 = scmp.ge.s32.totalorder %s1868_s22, 2 }
 0x329   : > { %s2375_s24 = sld [smem:[#allocation20_spill]] }
 0x32e   : > { %s1249_s7 = sand.u32 1, %s2374_s28  }
 0x32f   : > { %p2376_p2 = scmp.ne.s32.totalorder %s2375_s24, 0  ;;  %s1250_s27 = scalar_lea.sflag [#allocation4], %s1249_s7 }
 0x331   : > { %p1531_p6 = pnand %p2377_p4, %p2376_p2 }
 0x333   : > { %p1532_p12 = pneg %p1531_p6 }
 0x335   : > { %1839 = dma.done.wait (%p1532_p12), %s1250_s27, 256  }
 0x336   : > { %1841 = vsyncadd (%p1532_p12), %s1250_s27, 4294967040  ;;  %s2378_s30 = sadd.s32 4294967294, %s1868_s22  }
 0x337   : > { %s1258_s3 = sand.u32 1, %s2378_s30  }
 0x338   : > { %s1259_s25 = scalar_lea.sflag [#allocation12], %s1258_s3 }
 0x339   : > { %1843 = dma.done.wait (%p1532_p12), %s1259_s25, 512  }
 0x33a   : > { %1845 = vsyncadd (%p1532_p12), %s1259_s25, 4294966784  ;;  %s33_s22 = sadd.s32 1, %s1868_s22   ;;  %s2379_s26 = sld [smem:[#allocation21_spill]] }
 0x33b   : > { %p30_p5 = scmp.ge.s32.totalorder %s33_s22, 4   ;;  %s2380_s17 = smov %s1852_s18 }
 0x33c   : > { %s2381_s18 = smov %s1856_s19  ;;  %s2382_s19 = smov %s2058_s12 }
 0x33d   : > { %s2383_s20 = smov %s1864_s21  ;;  %32 = sbr.rel (!%p30_p5) target bundleno = 15 (0xf), region = 145 }
 0x340   : > { %s2384_s21 = smov %s2379_s26 }
 0x342   :  { %1273 = vsyncpa [#allocation3], 1 }
 0x343   :  { %1275 = vsyncpa [#allocation3 + $0x1], 1 }
 0x344   :  { %1276 = vsyncpa [#allocation6], 1 }
 0x345   :  { %1277 = vsyncpa [#allocation9], 1 }
 0x346   :  { %1278 = vsyncpa [#allocation4], 1 }
 0x347   :  { %1280 = vsyncpa [#allocation4 + $0x1], 1 }
 0x348   :  { %1281 = vsyncpa [#allocation12], 1 }
 0x349   :  { %1283 = vsyncpa [#allocation12 + $0x1], 1 }

// kernel: tpu_custom_call.1
= control target key start
LH: loop header
LB: loop body
LE: loop exit
PB: predicated region body
PF: predicated region fallthrough
CT: control target
= control target key end

     0   :  { %s2332_s0 = inlined_call_operand.hbm [shape: f32[2,8,32], index: 0, kind: input, shape index: {}]   ;;  %s2333_s1 = inlined_call_operand.vmem [shape: f32[1,32], index: 1, kind: input, shape index: {}]   ;;  %s2334_s2 = inlined_call_operand.vmem [shape: f32[1,32], index: 2, kind: input, shape index: {}]   ;;  %s2335_s3 = inlined_call_operand.hbm [shape: bf16[32,32], index: 3, kind: input, shape index: {}]   ;;  %s2336_s4 = inlined_call_operand.vmem [shape: f32[1,32], index: 4, kind: input, shape index: {}]   ;;  %s2337_s5 = inlined_call_operand.hbm [shape: bf16[32,32], index: 5, kind: input, shape index: {}]   ;;  %s2338_s6 = inlined_call_operand.vmem [shape: f32[1,32], index: 6, kind: input, shape index: {}]   ;;  %s2339_s7 = inlined_call_operand.hbm [shape: bf16[32,32], index: 7, kind: input, shape index: {}]   ;;  %s2340_s8 = inlined_call_operand.vmem [shape: f32[1,32], index: 8, kind: input, shape index: {}]   ;;  %s2341_s9 = inlined_call_operand.hbm [shape: bf16[2,4,8,8], index: 9, kind: output, shape index: {0}]   ;;  %s2342_s10 = inlined_call_operand.hbm [shape: bf16[2,4,8,8], index: 10, kind: output, shape index: {1}]   ;;  %s2343_s11 = inlined_call_operand.hbm [shape: bf16[2,4,8,8], index: 11, kind: output, shape index: {2}]  }
   0x1   :  { %2351 = sst [smem:[#allocation22_spill]] %s2335_s3 }
   0x2   :  { %2352 = sst [smem:[#allocation23_spill]] %s2337_s5 }
   0x3   :  { %2353 = sst [smem:[#allocation24_spill]] %s2339_s7 }
   0x4   :  { %2354 = sst [smem:[#allocation25_spill]] %s2343_s11 }
   0x5   :  { %17 = vsyncpa [#allocation3], 0 }
   0x6   :  { %19 = vsyncpa [#allocation3 + $0x1], 0 }
   0x7   :  { %20 = vsyncpa [#allocation6], 0 }
   0x8   :  { %21 = vsyncpa [#allocation9], 0 }
   0x9   :  { %22 = vsyncpa [#allocation4], 0 }
   0xa   :  { %24 = vsyncpa [#allocation4 + $0x1], 0 }
   0xb   :  { %25 = vsyncpa [#allocation12], 0 }
   0xc   :  { %27 = vsyncpa [#allocation12 + $0x1], 0  ;;  %s1948_s17 = smov 0   ;;  %s1950_s18 = smov 0  }
   0xd   :  { %s1952_s19 = smov 0   ;;  %s1954_s20 = smov 0  }
   0xe   :  { %s1956_s21 = smov 0   ;;  %s1958_s22 = smov 0  }
   0xf LB: > { %2355 = sst [smem:[#allocation19_spill]] %s1848_s17  ;;  %s1979_s23 = sadd.s32 4294967295, %s1868_s22   ;;  %s1868_s22 = sphi %s1958_s22, %s33_s22   ;;  %s1864_s21 = sphi %s1956_s21, %s2384_s21   ;;  %s1860_s20 = sphi %s1954_s20, %s2383_s20   ;;  %s1856_s19 = sphi %s1952_s19, %s2382_s19   ;;  %s1852_s18 = sphi %s1950_s18, %s2381_s18   ;;  %s1848_s17 = sphi %s1948_s17, %s2380_s17  }
  0x10   : > { %s2344_s24 = sadd.s32 4294967294, %s1868_s22   ;;  %p67_p0 = scmp.ne.s32.totalorder %s1852_s18, %s1848_s17 }
  0x11   : > { %p2346_p1 = scmp.eq.s32.totalorder %s1979_s23, 0  ;;  %p267_p3 = scmp.eq.s32.totalorder %s2344_s24, 1 }
  0x12   : > { %p1414_p5 = scmp.ge.s32.totalorder %s1868_s22, 1  ;;  %p330_p7 = scmp.lt.s32.totalorder %s1868_s22, 3 }
  0x13   : > { %p1990_p4 = por %p2346_p1, %p67_p0  ;;  %p1995_p6 = por %p267_p3, %p67_p0 }
  0x14   : > { %p2000_p8 = pnand %p1414_p5, %p330_p7  ;;  %s1870_s28 = smov [#allocation5]  }
  0x15   : > { %s2356_s25 = scalar_select %p1990_p4, 1, 0 }
  0x16   : > { %s2357_s26 = scalar_select %p1995_p6, 1, 0 }
  0x17   : > { %s348_s29 = sshll.u32 %s1870_s28, 4  ;;  %p1516_p9 = pneg %p2000_p8  ;;  %s349_s29 = int_to_ptr.vmem [resolvable:$true] %s348_s29 }
  0x18   : > { %2358 = sst [smem:[#allocation20_spill]] %s2357_s26  ;;  %s1871_s12 = smov [#allocation7]  }
  0x19   : > { %p2009_p11 = pnand %p1516_p9, %p2346_p1  ;;  %s364_s13 = sshll.u32 %s1871_s12, 4  ;;  %s365_s13 = int_to_ptr.vmem [resolvable:$true] %s364_s13 }
  0x1a   : > { %s1872_s14 = smov [#allocation8]   ;;  %s1629_s16 = scalar_lea.vmem %s349_s29, 256 }
  0x1b   : > { %s380_s15 = sshll.u32 %s1872_s14, 4  ;;  %p1620_p12 = pneg %p2009_p11  ;;  %s381_s15 = int_to_ptr.vmem [resolvable:$true] %s380_s15 }
  0x1c   : > { %p1630_p13 = scmp.ne.s32.totalorder %s349_s29, %s1629_s16  ;;  %p1637_p5 = scmp.lt.s32.totalorder %s349_s29, %s349_s29 }
  0x1d   : > { %p1638_p7 = scmp.lt.s32.totalorder %s1629_s16, %s1629_s16 }
  0x1e   : > { %p1632_p0 = pnand %p1630_p13, %p1620_p12 }
  0x1f   : > { %p1639_p9 = por %p1638_p7, %p1637_p5 }
  0x20   : > { %p1633_p3 = pneg %p1632_p0 }
  0x22   : > { %p1640_p10 = pnand %p1639_p9, %p1633_p3 }
  0x24   : > { %1643 = shalt.err (!%p1640_p10)
}
  0x25   : > { %s1873_s28 = smov 64   ;;  %s1874_s12 = smov 4  }
  0x26   : > { %s2361_s3 = sld [smem:[#allocation22_spill]]  ;;  %s1655_s26 = scalar_lea.vmem %s365_s13, 256 }
  0x27   : > { %p1656_p1 = scmp.ne.s32.totalorder %s365_s13, %s1655_s26  ;;  %p1663_p2 = scmp.lt.s32.totalorder %s365_s13, %s365_s13 }
  0x28   : > { %p1664_p6 = scmp.lt.s32.totalorder %s1655_s26, %s1655_s26 }
  0x29   : > { %p1658_p13 = pnand %p1656_p1, %p1620_p12 }
  0x2a   : > { %p1665_p5 = por %p1664_p6, %p1663_p2 }
  0x2b   : > { %p1659_p0 = pneg %p1658_p13 }
  0x2c   : > { %1519 = dma.hbm_to_vmem [thread:$0]  (!%p2009_p11), %s2361_s3, 256, %s349_s29, [#allocation6], %s1873_s28, %s1873_s28, %s1874_s12  }
  0x2d   : > { %p1666_p3 = pnand %p1665_p5, %p1659_p0 }
  0x2f   : > { %1669 = shalt.err (!%p1666_p3)
}
  0x30   : > { %s2362_s5 = sld [smem:[#allocation23_spill]]  ;;  %s1681_s24 = scalar_lea.vmem %s381_s15, 256 }
  0x31   : > { %p1682_p10 = scmp.ne.s32.totalorder %s381_s15, %s1681_s24  ;;  %p1689_p9 = scmp.lt.s32.totalorder %s381_s15, %s381_s15 }
  0x32   : > { %p1690_p13 = scmp.lt.s32.totalorder %s1681_s24, %s1681_s24 }
  0x33   : > { %p1684_p7 = pnand %p1682_p10, %p1620_p12 }
  0x34   : > { %p1691_p4 = por %p1690_p13, %p1689_p9 }
  0x35   : > { %p1685_p1 = pneg %p1684_p7 }
  0x36   : > { %1522 = dma.hbm_to_vmem [thread:$0]  (!%p2009_p11), %s2362_s5, 256, %s365_s13, [#allocation6], %s1873_s28, %s1873_s28, %s1874_s12  }
  0x37   : > { %p1692_p2 = pnand %p1691_p4, %p1685_p1 }
  0x39   : > { %1695 = shalt.err (!%p1692_p2)
}
  0x3a   : > { %s2363_s7 = sld [smem:[#allocation24_spill]]  ;;  %s54_s17 = sadd.s32 1, %s1856_s19 }
  0x3b   : > { %s45_s13 = sadd.s32 1, %s1864_s21  ;;  %p61_p4 = scmp.ne.s32.totalorder %s1856_s19, %s1852_s18 }
  0x3c   : > { %p47_p6 = scmp.ge.s32.totalorder %s45_s13, 2  ;;  %p62_p12 = scmp.eq.s32.totalorder %s1868_s22, 0 }
  0x3d   : > { %p2364_p0 = scmp.eq.s32.totalorder %s1979_s23, 1  ;;  %p1543_p3 = scmp.lt.s32.totalorder %s1868_s22, 2 }
  0x3e   : > { %s2386_s13 = smov (%p47_p6, %s45_s13), 0  ;;  %p63_p10 = por %p62_p12, %p61_p4 }
  0x3f   : > { %p2046_p5 = por %p2364_p0, %p61_p4  ;;  %2366 = sst [smem:[#allocation21_spill]] %s2386_s13 }
  0x40   : > { %1525 = dma.hbm_to_vmem [thread:$0]  (!%p2009_p11), %s2363_s7, 256, %s381_s15, [#allocation9], %s1873_s28, %s1873_s28, %s1874_s12  }
  0x41   : > { %s397_s14 = sand.u32 1, %s1856_s19   ;;  %s49_s16 = ssub.s32 %s1864_s21, %s2386_s13 }
  0x42   : > { %p52_p7 = scmp.eq.s32.totalorder %s49_s16, 0  ;;  %s1419_s15 = sshll.u32 %s397_s14, 3 }
  0x43   : > { %s1420_s28 = sshll.u32 %s1864_s21, 7  ;;  %s401_s3 = scalar_lea.vmem [#allocation2], %s1419_s15 }
  0x44   : > { %s2058_s12 = scalar_select %p52_p7, %s1856_s19, %s54_s17  }
  0x45   : > { %s407_s29 = scalar_lea.hbm %s2332_s0, %s1420_s28  ;;  %s409_s5 = sshll.u32 %s401_s3, 4  ;;  %s410_s5 = int_to_ptr.vmem [resolvable:$true] %s409_s5 }
  0x46   : > { %p2065_p11 = pnand %p1543_p3, %p63_p10  ;;  %s398_s11 = scalar_lea.sflag [#allocation3], %s397_s14 }
  0x47   : > { %s1709_s16 = scalar_lea.vmem %s410_s5, 128  ;;  %s1875_s17 = smov [#allocation2]  }
  0x48   : > { %p1698_p1 = pneg %p2065_p11  ;;  %p1710_p9 = scmp.ne.s32.totalorder %s410_s5, %s1709_s16 }
  0x49   : > { %s1714_s13 = sshll.u32 %s1875_s17, 4  ;;  %s1715_s13 = int_to_ptr.vmem [resolvable:$false] %s1714_s13 }
  0x4a   : > { %p1712_p13 = pnand %p1710_p9, %p1698_p1  ;;  %s1716_s28 = scalar_lea.vmem %s1715_s13, 256 }
  0x4b   : > { %p1717_p4 = scmp.lt.s32.totalorder %s410_s5, %s1715_s13  ;;  %p1718_p6 = scmp.lt.s32.totalorder %s1716_s28, %s1709_s16 }
  0x4c   : > { %p1713_p2 = pneg %p1712_p13 }
  0x4d   : > { %p1719_p12 = por %p1718_p6, %p1717_p4 }
  0x4f   : > { %p1720_p0 = pnand %p1719_p12, %p1713_p2 }
  0x51   : > { %1723 = shalt.err (!%p1720_p0)
}
  0x52   : > { %1529 = dma.hbm_to_vmem [thread:$0]  (!%p2065_p11), %s407_s29, 128, %s410_s5, %s398_s11  }
  0x53   : > { %418 = sbr.rel (%p2000_p8) target bundleno = 808 (0x328), region = 56  ;;  %s2076_s3 = sand.u32 (!%p2000_p8), 1, %s1852_s18  }
  0x54   : > { %s1422_s14 = sshll.u32 (!%p2000_p8), %s2076_s3, 3  ;;  %s421_s15 = scalar_lea.sflag (!%p2000_p8), [#allocation3], %s2076_s3 }
  0x55   : > { %s424_s24 = scalar_lea.vmem (!%p2000_p8), [#allocation2], %s1422_s14  ;;  %p2368_p3 = scmp.ne.s32.totalorder (!%p2000_p8), %s2356_s25, 0 }
  0x58   : > { %1827 = dma.done.wait (%p2368_p3), %s421_s15, 128  }
  0x59   : > { %1829 = vsyncadd (%p2368_p3), %s421_s15, 4294967168  ;;  %p2369_p10 = scmp.eq.s32.totalorder %s1979_s23, 0 }
  0x5b   : > { %1831 = dma.done.wait (%p2369_p10), [#allocation6], 512   ;;  %p2370_p7 = pmov %p2369_p10 }
  0x5d   : > { %1833 = vsyncadd (%p2370_p7), [#allocation6], 4294966784  ;;  %p2371_p8 = pmov %p2370_p7 }
  0x5e   : > { %p2372_p11 = pmov %p2370_p7 }
  0x5f   : > { %1835 = dma.done.wait (%p2371_p8), [#allocation9], 256  }
  0x60   : > { %1837 = vsyncadd (%p2372_p11), [#allocation9], 4294967040  ;;  %vm489_vm0 = vcmask 261120   ;;  %v486_v0 = vld [vmem:[%s424_s24] sm:$0xff]  ;;  %v1610_v7 = vld [vmem:[#allocation5 + $0x8] sm:$0xff]   ;;  %v1876_v9 = vmov 0.0   ;;  %v727_v45 = vlaneseq }
  0x61   : > { %v490_v1 = vsel %vm489_vm0, %v486_v0, 0.0  ;;  %v1611_v8 = vld [vmem:[#allocation7 + $0x8] sm:$0xff]   ;;  %1472 = vmatprep.subr.bf16.mxu0 %v1876_v9  ;;  %1480 = vmatprep.subr.bf16.mxu1 %v1876_v9  ;;  %v1612_v10 = vld [vmem:[#allocation5] sm:$0xff]   ;;  %v1613_v11 = vld [vmem:[#allocation7] sm:$0xff]   ;;  %vm1877_vm1 = vmmov 0   ;;  %s1878_s16 = smov 104  }
  0x62   : > { %491 = vadd.xlane.f32.xlu0 %v490_v1  ;;  %1473 = vmatpush3.bf16.msra.mxu0 %v1610_v7  ;;  %v1429_v16 = vld [vmem:[%s2333_s1] ss:$0 sm:$0xff]  ;;  %v1614_v21 = vld [vmem:[#allocation8 + $0x8] sm:$0xff]   ;;  %v1615_v23 = vld [vmem:[#allocation8] sm:$0xff]   ;;  %s1879_s17 = smov 120   ;;  %s1880_s28 = smov 112  }
  0x63   : > { %1481 = vmatpush3.bf16.msra.mxu1 %v1611_v8  ;;  %1474 = vmatprep.subr.bf16.mxu0 %v1876_v9  ;;  %v1430_v18 = vld [vmem:[%s2334_s2] ss:$0 sm:$0xff]  ;;  %v1881_v43 = vmov 1983009808   ;;  %v1882_v46 = vmov 1934713408  }
  0x64   : > { %1482 = vmatprep.subr.bf16.mxu1 %v1876_v9  ;;  %1476 = vmatprep.mubr.msk.bf16.mxu0 %vm1877_vm1, %v1876_v9  ;;  %v1435_v24 = vld [vmem:[%s2338_s6] ss:$0 sm:$0xff]  ;;  %v725_v44 = vunpack.c.l.s4 %v1881_v43  ;;  %v757_v47 = vunpack.c.l.s4 %v1882_v46  ;;  %v728_v49 = vshrl.u32 %v727_v45, 7  ;;  %s2144_s24 = sshll.u32 %s2076_s3, 4  ;;  %vm862_vm2 = vcmask 60416   ;;  %s1180_s5 = sand.u32 1, %s1979_s23  }
  0x65   : > { %1484 = vmatprep.mubr.msk.bf16.mxu1 %vm1877_vm1, %v1876_v9  ;;  %v1431_v28 = vld [vmem:[%s2336_s4] ss:$0 sm:$0xff]  ;;  %s2158_s7 = sshll.u32 %s1860_s20, 8  ;;  %s477_s11 = scalar_lea.vmem [#allocation11], %s2144_s24 }
  0x66   : > { %1475 = vmatpush3.bf16.msra.mxu0 %v1612_v10  ;;  %v1439_v41 = vld [vmem:[%s2340_s8] ss:$0 sm:$0xff]  ;;  %v726_v48 = vunpack.c.0.s8 %v725_v44  ;;  %v758_v52 = vunpack.c.0.s8 %v757_v47  ;;  %s1217_s25 = sshll.u32 %s477_s11, 4  ;;  %s2165_s20 = scalar_lea.hbm %s2342_s10, %s2158_s7  ;;  %s2167_s25 = int_to_ptr.vmem [resolvable:$true] %s1217_s25 }
  0x67   : > { %1483 = vmatpush3.bf16.msra.mxu1 %v1613_v11  ;;  %1488 = vmatprep.subr.bf16.mxu0 %v1876_v9  ;;  %s2179_s26 = scalar_lea.sflag [#allocation12], %s1180_s5  ;;  %s1724_s29 = scalar_lea.vmem %s2167_s25, 256 }
  0x68   : > { %v2125_v53 = vsub.s32 %v726_v48, %v728_v49  ;;  %v2127_v59 = vsub.s32 %v758_v52, %v728_v49  ;;  %p1725_p1 = scmp.ne.s32.totalorder %s2167_s25, %s1724_s29 }
  0x6a   : > { %p1726_p9 = pnand %p1725_p1, %p2046_p5 }
  0x6c   : > { %p1727_p13 = pneg %p1726_p9 }
  0xeb   : > { %v492_v2 = vpop.xlane.xlu0 %491 }
  0xec   : > { %v494_v3 = vmul.f32 0.03125, %v492_v2 }
  0xee   : > { %v495_v4 = vsub.f32 %v486_v0, %v494_v3 }
  0xf0   : > { %v496_v5 = vmul.f32 %v495_v4, %v495_v4 }
  0xf2   : > { %v497_v6 = vsel %vm489_vm0, %v496_v5, 0.0 }
  0xf3   : > { %498 = vadd.xlane.f32.xlu0 %v497_v6 }
 0x17c   : > { %v499_v12 = vpop.xlane.xlu0 %498 }
 0x17d   : > { %v500_v13 = vmul.f32 0.03125, %v499_v12 }
 0x17f   : > { %v501_v14 = vadd.f32 1e-06, %v500_v13 }
 0x181   : > { %1616 = vrsqrt.f32 %v501_v14 }
 0x18e   : > { %v1617_v15 = vpop.eup %1616 }
 0x18f   : > { %v503_v17 = vmul.f32 %v1617_v15, %v495_v4 }
 0x191   : > { %v510_v19 = vmul.f32 %v1429_v16, %v503_v17 }
 0x193   : > { %v517_v20 = vadd.f32 %v1430_v18, %v510_v19 }
 0x195   : > { %v518_v22 = vpack.c.bf16 %v517_v20, %v517_v20 }
 0x197   : > { %1477 = vmatmul.mubr.msk.bf16.vlgmr.msra.gmra.mxu0 %vm489_vm0, %v518_v22  ;;  %1485 = vmatmul.mubr.msk.bf16.vlgmr.msra.gmra.mxu1 %vm489_vm0, %v518_v22 }
 0x198   : > { %1489 = vmatpush3.bf16.msra.mxu0 %v1614_v21  ;;  %1492 = vmatprep.mubr.msk.bf16.mxu0 %vm1877_vm1, %v1876_v9 }
 0x199   : > { %1490 = vmatprep.subr.bf16.mxu0 %v1876_v9 }
 0x19c   : > { %1491 = vmatpush3.bf16.msra.mxu0 %v1615_v23 }
 0x19f   : > { %1493 = vmatmul.mubr.msk.bf16.vlgmr.msra.gmra.mxu0 %vm489_vm0, %v518_v22 }
 0x257   : > { %v579_v25 = vpop.f32.mrf.mxu0  ;;  %v643_v26 = vpop.f32.mrf.mxu1 }
 0x258   : > { %v644_v27 = vadd.f32 %v1435_v24, %v643_v26  ;;  %v580_v33 = vadd.f32 %v1431_v28, %v579_v25 }
 0x259   : > { %v1478_v29 = vpop.f32.mrf.mxu0  ;;  %v1486_v30 = vpop.f32.mrf.mxu1 }
 0x25a   : > { %874 = vrot.lane.b32.xlu0 %v644_v27, %s1878_s16  ;;  %868 = vrot.lane.b32.xlu1 %v644_v27, %s1879_s17  ;;  %v2112_v37 = vmul.f32 0.35355338, %v580_v33 }
 0x25b   : > { %v582_v31 = vpop.f32.mrf.mxu0  ;;  %v646_v32 = vpop.f32.mrf.mxu1 }
 0x25d   : > { %v1479_v34 = vpop.f32.mrf.mxu0  ;;  %v1487_v35 = vpop.f32.mrf.mxu1 }
 0x25e   : > { %871 = vrot.lane.b32.xlu1 %v644_v27, %s1880_s28 }
 0x25f   : > { %v706_v36 = vpop.f32.mrf.mxu0 }
 0x260   : > { %v2120_v42 = vadd.f32 %v1439_v41, %v706_v36 }
 0x261   : > { %v1494_v38 = vpop.f32.mrf.mxu0 }
 0x262   : > { %713 = vrot.lane.b32.xlu1 %v2112_v37, %s1879_s17 }
 0x263   : > { %v709_v39 = vpop.f32.mrf.mxu0 }
 0x265   : > { %v1495_v40 = vpop.f32.mrf.mxu0 }
 0x266   : > { %716 = vrot.lane.b32.xlu1 %v2112_v37, %s1880_s28 }
 0x26a   : > { %719 = vrot.lane.b32.xlu1 %v2112_v37, %s1878_s16 }
 0x26e   : > { %1022 = vrot.lane.b32.xlu1 %v2120_v42, %s1879_s17 }
 0x272   : > { %1025 = vrot.lane.b32.xlu1 %v2120_v42, %s1880_s28 }
 0x276   : > { %1028 = vrot.lane.b32.xlu1 %v2120_v42, %s1878_s16  ;;  %s1883_s16 = smov [#allocation11]  }
 0x277   : > { %s1728_s17 = sshll.u32 %s1883_s16, 4  ;;  %s1729_s17 = int_to_ptr.vmem [resolvable:$false] %s1728_s17 }
 0x278   : > { %s1730_s28 = scalar_lea.vmem %s1729_s17, 512  ;;  %p1731_p2 = scmp.lt.s32.totalorder %s2167_s25, %s1729_s17 }
 0x279   : > { %p1732_p4 = scmp.lt.s32.totalorder %s1730_s28, %s1724_s29 }
 0x27b   : > { %p1733_p6 = por %p1732_p4, %p1731_p2 }
 0x27d   : > { %p1734_p12 = pnand %p1733_p6, %p1727_p13 }
 0x2cc   : > { %v875_v50 = vpop.permute.xlu0 %874  ;;  %v869_v51 = vpop.permute.xlu1 %868 }
 0x2cd   : > { %v893_v54 = vcombine.low %v869_v51, %v875_v50  ;;  %v894_v55 = vcombine.high %v869_v51, %v875_v50 }
 0x2cf   : > { %v901_v60 = vrot.slane %v893_v54, %v2125_v53  ;;  %v908_v61 = vrot.slane %v894_v55, %v2125_v53 }
 0x2d0   : > { %v872_v56 = vpop.permute.xlu1 %871 }
 0x2d1   : > { %v877_v57 = vcombine.low %v644_v27, %v872_v56  ;;  %v878_v58 = vcombine.high %v644_v27, %v872_v56 }
 0x2d3   : > { %v885_v62 = vrot.slane %v877_v57, %v2125_v53  ;;  %v892_v63 = vrot.slane %v878_v58, %v2125_v53 }
 0x2d4   : > { %v714_v0 = vpop.permute.xlu1 %713 }
 0x2d5   : > { %v909_v1 = vcombine.low %v885_v62, %v901_v60  ;;  %v910_v2 = vcombine.high %v885_v62, %v901_v60  ;;  %v925_v3 = vcombine.low %v892_v63, %v908_v61  ;;  %v926_v4 = vcombine.high %v892_v63, %v908_v61 }
 0x2d7   : > { %v917_v5 = vrot.slane %v909_v1, %v2127_v59  ;;  %v924_v6 = vrot.slane %v910_v2, %v2127_v59  ;;  %v933_v7 = vrot.slane %v925_v3, %v2127_v59  ;;  %v940_v8 = vrot.slane %v926_v4, %v2127_v59 }
 0x2d8   : > { %v717_v9 = vpop.permute.xlu1 %716 }
 0x2d9   : > { %v945_v10 = vcombine.low %v917_v5, %v924_v6  ;;  %v1445_v11 = vcombine.high %v917_v5, %v924_v6  ;;  %v961_v12 = vcombine.low %v933_v7, %v940_v8  ;;  %v1446_v13 = vcombine.high %v933_v7, %v940_v8 }
 0x2da   : > { %v722_v18 = vcombine.low %v2112_v37, %v717_v9  ;;  %v723_v19 = vcombine.high %v2112_v37, %v717_v9 }
 0x2db   : > { %v952_v14 = vrot.slane %v945_v10, %v2125_v53  ;;  %v960_v15 = vrot.slane %v1445_v11, %v2125_v53  ;;  %v968_v16 = vrot.slane %v961_v12, %v2125_v53  ;;  %v976_v17 = vrot.slane %v1446_v13, %v2125_v53 }
 0x2dc   : > { %v720_v20 = vpop.permute.xlu1 %719  ;;  %v730_v31 = vrot.slane %v722_v18, %v2125_v53  ;;  %v737_v32 = vrot.slane %v723_v19, %v2125_v53 }
 0x2dd   : > { %v977_v21 = vcombine.low %v952_v14, %v960_v15  ;;  %v978_v22 = vcombine.high %v952_v14, %v960_v15  ;;  %v993_v23 = vcombine.low %v968_v16, %v976_v17  ;;  %v994_v24 = vcombine.high %v968_v16, %v976_v17 }
 0x2de   : > { %v738_v25 = vcombine.low %v714_v0, %v720_v20  ;;  %v739_v26 = vcombine.high %v714_v0, %v720_v20 }
 0x2df   : > { %v985_v27 = vrot.slane %v977_v21, %v2127_v59  ;;  %v992_v28 = vrot.slane %v978_v22, %v2127_v59  ;;  %v1001_v29 = vrot.slane %v993_v23, %v2127_v59  ;;  %v1008_v30 = vrot.slane %v994_v24, %v2127_v59 }
 0x2e0   : > { %v746_v33 = vrot.slane %v738_v25, %v2125_v53  ;;  %v753_v34 = vrot.slane %v739_v26, %v2125_v53  ;;  %v2155_v35 = vpop.permute.xlu1 %1022 }
 0x2e1   : > { %v1009_v36 = vcombine.low %v985_v27, %v1001_v29  ;;  %v1010_v37 = vcombine.high %v985_v27, %v1001_v29  ;;  %v1011_v38 = vcombine.low %v992_v28, %v1008_v30  ;;  %v1012_v39 = vcombine.high %v992_v28, %v1008_v30 }
 0x2e2   : > { %v754_v40 = vcombine.low %v730_v31, %v746_v33  ;;  %v755_v41 = vcombine.high %v730_v31, %v746_v33  ;;  %v770_v43 = vcombine.low %v737_v32, %v753_v34  ;;  %v771_v44 = vcombine.high %v737_v32, %v753_v34 }
 0x2e3   : > { %v1013_v45 = vpack.c.bf16 %v1009_v36, %v1009_v36  ;;  %v1014_v46 = vpack.c.bf16 %v1010_v37, %v1010_v37  ;;  %v1015_v47 = vpack.c.bf16 %v1011_v38, %v1011_v38  ;;  %v1016_v48 = vpack.c.bf16 %v1012_v39, %v1012_v39 }
 0x2e4   : > { %v762_v49 = vrot.slane %v754_v40, %v2127_v59  ;;  %v769_v50 = vrot.slane %v755_v41, %v2127_v59  ;;  %v778_v51 = vrot.slane %v770_v43, %v2127_v59  ;;  %v785_v52 = vrot.slane %v771_v44, %v2127_v59  ;;  %v1026_v54 = vpop.permute.xlu1 %1025 }
 0x2e5   : > { %1017 = vst.msk [vmem:[%s477_s11] sm:$0xf] %vm862_vm2, %v1013_v45  ;;  %1018 = vst.msk [vmem:[%s477_s11 + $0x4] sm:$0xf] %vm862_vm2, %v1014_v46 }
 0x2e6   : > { %1019 = vst.msk [vmem:[%s477_s11 + $0x8] sm:$0xf] %vm862_vm2, %v1015_v47  ;;  %1020 = vst.msk [vmem:[%s477_s11 + $0xc] sm:$0xf] %vm862_vm2, %v1016_v48  ;;  %v790_v55 = vcombine.low %v762_v49, %v769_v50  ;;  %v1443_v56 = vcombine.high %v762_v49, %v769_v50  ;;  %v806_v57 = vcombine.low %v778_v51, %v785_v52 }
 0x2e7   : > { %v1444_v58 = vcombine.high %v778_v51, %v785_v52 }
 0x2e8   : > { %1737 = shalt.err (!%p1734_p12)
}
 0x2e9   : > { %s1738_s23 = scalar_lea.hbm %s2165_s20, 256  ;;  %s1742_s5 = scalar_lea.hbm %s2342_s10, 512 }
 0x2ea   : > { %p1739_p0 = scmp.ne.s32.totalorder %s2165_s20, %s1738_s23  ;;  %p1743_p7 = scmp.lt.s32.totalorder %s2165_s20, %s2342_s10 }
 0x2eb   : > { %p1744_p8 = scmp.lt.s32.totalorder %s1742_s5, %s1738_s23 }
 0x2ec   : > { %p1740_p3 = pnand %p1739_p0, %p2046_p5 }
 0x2ed   : > { %p1745_p11 = por %p1744_p8, %p1743_p7 }
 0x2ee   : > { %p1741_p10 = pneg %p1740_p3 }
 0x2f0   : > { %p1746_p1 = pnand %p1745_p11, %p1741_p10 }
 0x2f2   : > { %1749 = shalt.err (!%p1746_p1)
}
 0x2f3   : > { %s1884_s13 = smov 64   ;;  %s1885_s29 = smov 4   ;;  %v1031_v60 = vcombine.low %v2120_v42, %v1026_v54  ;;  %v1032_v61 = vcombine.high %v2120_v42, %v1026_v54  ;;  %v797_v62 = vrot.slane %v790_v55, %v2125_v53  ;;  %v805_v63 = vrot.slane %v1443_v56, %v2125_v53  ;;  %v1029_v2 = vpop.permute.xlu1 %1028 }
 0x2f4   : > { %1511 = dma.vmem_to_hbm [thread:$0]  (%p2046_p5), %s2167_s25, 256, %s2165_s20, %s2179_s26, %s1884_s13, %s1884_s13, %s1885_s29   ;;  %v813_v0 = vrot.slane %v806_v57, %v2125_v53  ;;  %v821_v1 = vrot.slane %v1444_v58, %v2125_v53  ;;  %v1047_v3 = vcombine.low %v2155_v35, %v1029_v2  ;;  %v1048_v4 = vcombine.high %v2155_v35, %v1029_v2 }
 0x2f5   : > { %v822_v5 = vcombine.low %v797_v62, %v805_v63  ;;  %v823_v6 = vcombine.high %v797_v62, %v805_v63  ;;  %v1039_v42 = vrot.slane %v1031_v60, %v2125_v53  ;;  %v1046_v9 = vrot.slane %v1032_v61, %v2125_v53  ;;  %s470_s25 = scalar_lea.vmem [#allocation10], %s2144_s24  ;;  %s2230_s28 = scalar_lea.hbm %s2341_s9, %s2158_s7 }
 0x2f6   : > { %v838_v7 = vcombine.low %v813_v0, %v821_v1  ;;  %v839_v8 = vcombine.high %v813_v0, %v821_v1  ;;  %v1055_v10 = vrot.slane %v1047_v3, %v2125_v53  ;;  %v1062_v11 = vrot.slane %v1048_v4, %v2125_v53  ;;  %s1200_s20 = sshll.u32 %s470_s25, 4  ;;  %s1176_s23 = scalar_lea.sflag [#allocation4], %s2076_s3  ;;  %s2232_s20 = int_to_ptr.vmem [resolvable:$true] %s1200_s20 }
 0x2f7   : > { %v830_v12 = vrot.slane %v822_v5, %v2127_v59  ;;  %v837_v13 = vrot.slane %v823_v6, %v2127_v59  ;;  %s1750_s14 = scalar_lea.vmem %s2232_s20, 256  ;;  %s1886_s15 = smov [#allocation10]  }
 0x2f8   : > { %v846_v14 = vrot.slane %v838_v7, %v2127_v59  ;;  %v853_v15 = vrot.slane %v839_v8, %v2127_v59  ;;  %v1063_v16 = vcombine.low %v1039_v42, %v1055_v10  ;;  %v1064_v17 = vcombine.high %v1039_v42, %v1055_v10  ;;  %p1751_p9 = scmp.ne.s32.totalorder %s2232_s20, %s1750_s14  ;;  %s1754_s5 = sshll.u32 %s1886_s15, 4  ;;  %s1755_s5 = int_to_ptr.vmem [resolvable:$false] %s1754_s5 }
 0x2f9   : > { %v1079_v18 = vcombine.low %v1046_v9, %v1062_v11  ;;  %v1080_v19 = vcombine.high %v1046_v9, %v1062_v11  ;;  %s1756_s11 = scalar_lea.vmem %s1755_s5, 512  ;;  %p1757_p4 = scmp.lt.s32.totalorder %s2232_s20, %s1755_s5 }
 0x2fa   : > { %v854_v20 = vcombine.low %v830_v12, %v846_v14  ;;  %v855_v21 = vcombine.high %v830_v12, %v846_v14  ;;  %v856_v22 = vcombine.low %v837_v13, %v853_v15  ;;  %v857_v23 = vcombine.high %v837_v13, %v853_v15  ;;  %p1752_p13 = pnand %p1751_p9, %p2046_p5  ;;  %p1758_p6 = scmp.lt.s32.totalorder %s1756_s11, %s1750_s14 }
 0x2fb   : > { %v1071_v24 = vrot.slane %v1063_v16, %v2127_v59  ;;  %v1078_v25 = vrot.slane %v1064_v17, %v2127_v59  ;;  %v1087_v26 = vrot.slane %v1079_v18, %v2127_v59  ;;  %v1094_v27 = vrot.slane %v1080_v19, %v2127_v59 }
 0x2fc   : > { %v858_v28 = vpack.c.bf16 %v854_v20, %v854_v20  ;;  %v859_v29 = vpack.c.bf16 %v855_v21, %v855_v21  ;;  %v860_v30 = vpack.c.bf16 %v856_v22, %v856_v22  ;;  %v861_v31 = vpack.c.bf16 %v857_v23, %v857_v23  ;;  %p1753_p2 = pneg %p1752_p13  ;;  %p1759_p12 = por %p1758_p6, %p1757_p4 }
 0x2fd   : > { %v1099_v32 = vcombine.low %v1071_v24, %v1078_v25  ;;  %v1447_v33 = vcombine.high %v1071_v24, %v1078_v25  ;;  %v1115_v34 = vcombine.low %v1087_v26, %v1094_v27  ;;  %v1448_v35 = vcombine.high %v1087_v26, %v1094_v27 }
 0x2fe   : > { %863 = vst.msk [vmem:[%s470_s25] sm:$0xf] %vm862_vm2, %v858_v28  ;;  %864 = vst.msk [vmem:[%s470_s25 + $0x4] sm:$0xf] %vm862_vm2, %v859_v29  ;;  %p1760_p0 = pnand %p1759_p12, %p1753_p2 }
 0x2ff   : > { %865 = vst.msk [vmem:[%s470_s25 + $0x8] sm:$0xf] %vm862_vm2, %v860_v30  ;;  %866 = vst.msk [vmem:[%s470_s25 + $0xc] sm:$0xf] %vm862_vm2, %v861_v31  ;;  %v1106_v36 = vrot.slane %v1099_v32, %v2125_v53  ;;  %v1114_v37 = vrot.slane %v1447_v33, %v2125_v53  ;;  %v1122_v38 = vrot.slane %v1115_v34, %v2125_v53 }
 0x300   : > { %v1130_v39 = vrot.slane %v1448_v35, %v2125_v53 }
 0x301   : > { %1763 = shalt.err (!%p1760_p0)
}
 0x302   : > { %s1764_s27 = scalar_lea.hbm %s2230_s28, 256  ;;  %s1768_s16 = scalar_lea.hbm %s2341_s9, 512 }
 0x303   : > { %p1765_p3 = scmp.ne.s32.totalorder %s2230_s28, %s1764_s27  ;;  %p1769_p8 = scmp.lt.s32.totalorder %s2230_s28, %s2341_s9 }
 0x304   : > { %p1770_p11 = scmp.lt.s32.totalorder %s1768_s16, %s1764_s27 }
 0x305   : > { %p1766_p10 = pnand %p1765_p3, %p2046_p5 }
 0x306   : > { %p1771_p1 = por %p1770_p11, %p1769_p8 }
 0x307   : > { %p1767_p7 = pneg %p1766_p10 }
 0x309   : > { %p1772_p9 = pnand %p1771_p1, %p1767_p7 }
 0x30b   : > { %1775 = shalt.err (!%p1772_p9)
}
 0x30c   : > { %1510 = dma.vmem_to_hbm [thread:$0]  (%p2046_p5), %s2232_s20, 256, %s2230_s28, %s1176_s23, %s1884_s13, %s1884_s13, %s1885_s29   ;;  %v1131_v53 = vcombine.low %v1106_v36, %v1114_v37  ;;  %v1132_v40 = vcombine.high %v1106_v36, %v1114_v37  ;;  %v1147_v41 = vcombine.low %v1122_v38, %v1130_v39  ;;  %v1148_v43 = vcombine.high %v1122_v38, %v1130_v39 }
 0x30d   : > { %s484_s14 = scalar_lea.vmem [#allocation13], %s2144_s24  ;;  %s2373_s23 = sld [smem:[#allocation25_spill]] }
 0x30e   : > { %v1139_v44 = vrot.slane %v1131_v53, %v2127_v59  ;;  %v1146_v45 = vrot.slane %v1132_v40, %v2127_v59  ;;  %v1155_v46 = vrot.slane %v1147_v41, %v2127_v59  ;;  %v1162_v47 = vrot.slane %v1148_v43, %v2127_v59  ;;  %s1234_s5 = sshll.u32 %s484_s14, 4  ;;  %s2277_s5 = int_to_ptr.vmem [resolvable:$true] %s1234_s5 }
 0x30f   : > { %s1776_s24 = scalar_lea.vmem %s2277_s5, 256 }
 0x310   : > { %v1163_v48 = vcombine.low %v1139_v44, %v1155_v46  ;;  %v1164_v49 = vcombine.high %v1139_v44, %v1155_v46  ;;  %v1165_v50 = vcombine.low %v1146_v45, %v1162_v47  ;;  %v1166_v51 = vcombine.high %v1146_v45, %v1162_v47  ;;  %p1777_p13 = scmp.ne.s32.totalorder %s2277_s5, %s1776_s24 }
 0x312   : > { %v1167_v52 = vpack.c.bf16 %v1163_v48, %v1163_v48  ;;  %v1168_v54 = vpack.c.bf16 %v1164_v49, %v1164_v49  ;;  %v1169_v55 = vpack.c.bf16 %v1165_v50, %v1165_v50  ;;  %v1170_v56 = vpack.c.bf16 %v1166_v51, %v1166_v51  ;;  %p1778_p2 = pnand %p1777_p13, %p2046_p5 }
 0x313   : > { %s2275_s11 = scalar_lea.hbm %s2373_s23, %s2158_s7  ;;  %s1887_s7 = smov [#allocation13]  }
 0x314   : > { %1171 = vst.msk [vmem:[%s484_s14] sm:$0xf] %vm862_vm2, %v1167_v52  ;;  %1172 = vst.msk [vmem:[%s484_s14 + $0x4] sm:$0xf] %vm862_vm2, %v1168_v54  ;;  %p1779_p4 = pneg %p1778_p2  ;;  %s1780_s27 = sshll.u32 %s1887_s7, 4  ;;  %s1781_s27 = int_to_ptr.vmem [resolvable:$false] %s1780_s27 }
 0x315   : > { %1173 = vst.msk [vmem:[%s484_s14 + $0x8] sm:$0xf] %vm862_vm2, %v1169_v55  ;;  %1174 = vst.msk [vmem:[%s484_s14 + $0xc] sm:$0xf] %vm862_vm2, %v1170_v56  ;;  %s1782_s3 = scalar_lea.vmem %s1781_s27, 512  ;;  %p1783_p6 = scmp.lt.s32.totalorder %s2277_s5, %s1781_s27 }
 0x316   : > { %p1784_p12 = scmp.lt.s32.totalorder %s1782_s3, %s1776_s24 }
 0x318   : > { %p1785_p0 = por %p1784_p12, %p1783_p6 }
 0x31a   : > { %p1786_p3 = pnand %p1785_p0, %p1779_p4 }
 0x31c   : > { %1789 = shalt.err (!%p1786_p3)
}
 0x31d   : > { %s1790_s25 = scalar_lea.hbm %s2275_s11, 256  ;;  %s1794_s15 = scalar_lea.hbm %s2373_s23, 512 }
 0x31e   : > { %p1791_p10 = scmp.ne.s32.totalorder %s2275_s11, %s1790_s25  ;;  %p1795_p11 = scmp.lt.s32.totalorder %s2275_s11, %s2373_s23 }
 0x31f   : > { %p1796_p1 = scmp.lt.s32.totalorder %s1794_s15, %s1790_s25 }
 0x320   : > { %p1792_p7 = pnand %p1791_p10, %p2046_p5 }
 0x321   : > { %p1797_p9 = por %p1796_p1, %p1795_p11 }
 0x322   : > { %p1793_p8 = pneg %p1792_p7 }
 0x324   : > { %p1798_p13 = pnand %p1797_p9, %p1793_p8 }
 0x326   : > { %1801 = shalt.err (!%p1798_p13)
}
 0x327   : > { %1512 = dma.vmem_to_hbm [thread:$0]  (%p2046_p5), %s2277_s5, 256, %s2275_s11, %s2179_s26, %s1884_s13, %s1884_s13, %s1885_s29  }
 0x328 PF: > { %s2374_s28 = sld [smem:[#allocation19_spill]]  ;;  %p2377_p4 = scmp.ge.s32.totalorder %s1868_s22, 2 }
 0x329   : > { %s2375_s24 = sld [smem:[#allocation20_spill]] }
 0x32e   : > { %s1249_s7 = sand.u32 1, %s2374_s28  }
 0x32f   : > { %p2376_p2 = scmp.ne.s32.totalorder %s2375_s24, 0  ;;  %s1250_s27 = scalar_lea.sflag [#allocation4], %s1249_s7 }
 0x331   : > { %p1531_p6 = pnand %p2377_p4, %p2376_p2 }
 0x333   : > { %p1532_p12 = pneg %p1531_p6 }
 0x335   : > { %1839 = dma.done.wait (%p1532_p12), %s1250_s27, 256  }
 0x336   : > { %1841 = vsyncadd (%p1532_p12), %s1250_s27, 4294967040  ;;  %s2378_s30 = sadd.s32 4294967294, %s1868_s22  }
 0x337   : > { %s1258_s3 = sand.u32 1, %s2378_s30  }
 0x338   : > { %s1259_s25 = scalar_lea.sflag [#allocation12], %s1258_s3 }
 0x339   : > { %1843 = dma.done.wait (%p1532_p12), %s1259_s25, 512  }
 0x33a   : > { %1845 = vsyncadd (%p1532_p12), %s1259_s25, 4294966784  ;;  %s33_s22 = sadd.s32 1, %s1868_s22   ;;  %s2379_s26 = sld [smem:[#allocation21_spill]] }
 0x33b   : > { %p30_p5 = scmp.ge.s32.totalorder %s33_s22, 4   ;;  %s2380_s17 = smov %s1852_s18 }
 0x33c   : > { %s2381_s18 = smov %s1856_s19  ;;  %s2382_s19 = smov %s2058_s12 }
 0x33d   : > { %s2383_s20 = smov %s1864_s21  ;;  %32 = sbr.rel (!%p30_p5) target bundleno = 15 (0xf), region = 145 }
 0x340   : > { %s2384_s21 = smov %s2379_s26 }
 0x342   :  { %1273 = vsyncpa [#allocation3], 1 }
 0x343   :  { %1275 = vsyncpa [#allocation3 + $0x1], 1 }
 0x344   :  { %1276 = vsyncpa [#allocation6], 1 }
 0x345   :  { %1277 = vsyncpa [#allocation9], 1 }
 0x346   :  { %1278 = vsyncpa [#allocation4], 1 }
 0x347   :  { %1280 = vsyncpa [#allocation4 + $0x1], 1 }
 0x348   :  { %1281 = vsyncpa [#allocation12], 1 }
 0x349   :  { %1283 = vsyncpa [#allocation12 + $0x1], 1 }

</bundles_post_ra>
